<compile_context>
chip_gen: v7x
topology: tpu7x:2x2x1
jax: 0.10.0
libtpu: 0.0.40
codegen_flags: <defaults>
</compile_context>

<pallas_src>
import functools
import math

import numpy as np
import jax
import jax.numpy as jnp
from jax.experimental import pallas as pl
from jax.experimental.pallas import tpu as pltpu


def _nerf_encode_kernel(tbl_ref, xin_ref, out_ref, *, exact_cos):
    """One batch-group tile.

    tbl_ref : (2, W) f32 constants; row 0 = 2^k * pi per lane,
              row 1 = pi/2 on cos lanes, 0 on sin lanes.
    xin_ref : (TBG, W) f32, input coordinate replicated so lane l already
              holds the x value feeding output lane l.
    out_ref : (TBG, W) output tile (lane-dense, W a multiple of 128).
    """
    xin = xin_ref[...]                       # (TBG, W) f32
    freq = tbl_ref[0:1, :]                   # (1, W)
    offs = tbl_ref[1:2, :]                   # (1, W)

    phase = xin * freq                       # single f32 mul: bit-identical
                                             # to the reference phase
    if exact_cos:
        # Exact variant: 2x transcendental work, no pi/2 argument rounding.
        is_cos = offs != 0.0
        out = jnp.where(is_cos, jnp.cos(phase), jnp.sin(phase))
    else:
        # cos(x) == sin(x + pi/2): one transcendental per output lane.
        out = jnp.sin(phase + offs)
    out_ref[...] = out.astype(out_ref.dtype)


def _encode_impl(x, N, *, tile_g=256, out_dtype=None, exact_cos=False):
    if x.ndim == 1:                          # matches the PyTorch unsqueeze
        x = x[None, :]
    x = x.astype(jnp.float32)
    B, D = x.shape
    two_dn = 2 * D * N
    out_dtype = jnp.dtype(jnp.float32) if out_dtype is None else jnp.dtype(out_dtype)

    # ---- batch-group fold: make the kernel minor dim a large multiple of 128.
    g = 128 // math.gcd(two_dn, 128)
    g *= max(1, -(-512 // (g * two_dn)))     # widen to >= 512 lanes
    W = g * two_dn

    B_pad = -(-B // g) * g
    if B_pad != B:
        x = jnp.concatenate(
            [x, jnp.zeros((B_pad - B, D), jnp.float32)], axis=0)
    Bg = B_pad // g

    # Wrapper-side replication: xin[b, h*D*N + d*N + k] = x[b, d].
    # Single broadcast copy over the *input* (tiny vs. the output), then a
    # free contiguous reshape to the group-folded layout.
    xin = jnp.broadcast_to(
        x[:, None, :, None], (B_pad, 2, D, N)).reshape(Bg, W)

    # Compile-time constant tables (numpy), tiled to the folded width.
    freqs = (2.0 ** np.arange(N, dtype=np.float32)) * np.float32(math.pi)
    row_freq = np.tile(freqs, 2 * D)                                   # (2DN,)
    row_offs = np.concatenate(
        [np.zeros(D * N, np.float32),
         np.full(D * N, np.float32(math.pi / 2.0), np.float32)])       # (2DN,)
    tbl = jnp.asarray(
        np.stack([np.tile(row_freq, g), np.tile(row_offs, g)]).astype(np.float32))

    # ---- tile selection: modest blocks (VMEM-safe on v5e/v7x), >= 2 grid
    # steps whenever Bg allows it (v7x megacore), sublane dim multiple of 8.
    bytes_per_row = W * 4
    rows_budget = max(8, ((2 * 1024 * 1024) // bytes_per_row) // 8 * 8)
    if Bg <= 8:
        tbg = Bg                              # full (exempt from 8-row rule)
    else:
        half = -(-Bg // 2)
        half = -(-half // 8) * 8
        tbg = min(int(tile_g), rows_budget, half)
        tbg = max(8, (tbg // 8) * 8)
    grid = (pl.cdiv(Bg, tbg),)

    n_elems = B_pad * two_dn
    cost = pl.CostEstimate(
        flops=(2 if not exact_cos else 3) * n_elems,
        transcendentals=(1 if not exact_cos else 2) * n_elems,
        bytes_accessed=n_elems * 4 + n_elems * out_dtype.itemsize + 2 * W * 4,
    )

    out_fold = pl.pallas_call(
        functools.partial(_nerf_encode_kernel, exact_cos=exact_cos),
        out_shape=jax.ShapeDtypeStruct((Bg, W), out_dtype),
        grid=grid,
        in_specs=[
            pl.BlockSpec((2, W), lambda i: (0, 0)),     # constant tables
            pl.BlockSpec((tbg, W), lambda i: (i, 0)),   # replicated-x tile
        ],
        out_specs=pl.BlockSpec((tbg, W), lambda i: (i, 0)),
        compiler_params=pltpu.CompilerParams(
            dimension_semantics=("parallel",),          # megacore on v7x
            vmem_limit_bytes=32 * 1024 * 1024,
        ),
        cost_estimate=cost,
    )(tbl, xin)

    out = out_fold.reshape(B_pad, two_dn)               # contiguous view back
    if B_pad != B:
        out = out[:B]
    return out


vanilla_nerf_encode = jax.jit(
    _encode_impl,
    static_argnums=(1,),
    static_argnames=("tile_g", "out_dtype", "exact_cos"),
)


def _reference_encode(x, N):
    """Pure-JAX reference mirroring the PyTorch module."""
    if x.ndim == 1:
        x = x[None, :]
    k = jnp.arange(N, dtype=jnp.float32)
    freqs = (2.0 ** k) * math.pi
    phase = (x[:, :, None] * freqs[None, None, :]).reshape(x.shape[0], -1)
    return jnp.concatenate([jnp.sin(phase), jnp.cos(phase)], axis=-1)


if __name__ == "__main__":
    D, N = 3, 10
    key = jax.random.PRNGKey(0)

    # Main case: B=512 -> fold G=32 -> 16 group rows, tile 8 -> 2 grid steps.
    B = 512
    x = jax.random.uniform(key, (B, D), jnp.float32, minval=-1.0, maxval=1.0)
    ref = _reference_encode(x, N)

    out_fast = jax.block_until_ready(vanilla_nerf_encode(x, N))
    assert out_fast.shape == (B, 2 * D * N), out_fast.shape
    # sin(phase+pi/2) cos-folding adds <= ~0.5 ulp(phase) argument rounding at
    # phases up to 2^9*pi, plus Mosaic-vs-XLA sin/cos impl differences.
    assert jnp.allclose(out_fast, ref, atol=5e-4, rtol=1e-4), \
        float(jnp.max(jnp.abs(out_fast - ref)))

    out_exact = jax.block_until_ready(vanilla_nerf_encode(x, N, exact_cos=True))
    assert jnp.allclose(out_exact, ref, atol=1e-4, rtol=1e-4), \
        float(jnp.max(jnp.abs(out_exact - ref)))

    # Batch not a multiple of the fold group -> padded / sliced path.
    xb = jax.random.uniform(jax.random.PRNGKey(1), (100, D), jnp.float32,
                            minval=-1.0, maxval=1.0)
    outb = jax.block_until_ready(vanilla_nerf_encode(xb, N))
    refb = _reference_encode(xb, N)
    assert outb.shape == (100, 2 * D * N), outb.shape
    assert jnp.allclose(outb, refb, atol=5e-4, rtol=1e-4), \
        float(jnp.max(jnp.abs(outb - refb)))

    # 1-D input promotion path (matches the PyTorch unsqueeze behavior).
    x1 = jax.random.uniform(jax.random.PRNGKey(2), (D,), jnp.float32,
                            minval=-1.0, maxval=1.0)
    out1 = jax.block_until_ready(vanilla_nerf_encode(x1, N))
    ref1 = _reference_encode(x1, N)
    assert out1.shape == (1, 2 * D * N), out1.shape
    assert jnp.allclose(out1, ref1, atol=5e-4, rtol=1e-4)

    print("KERNEL_OK")
</pallas_src>

<mosaic_0001>
module attributes {stable_mosaic.version = 11 : i64} {
  func.func @_nerf_encode_kernel(%arg0: i32, %arg1: memref<2x1920xf32, #tpu.memory_space<vmem>>, %arg2: memref<8x1920xf32, #tpu.memory_space<vmem>>, %arg3: memref<8x1920xf32, #tpu.memory_space<vmem>>) attributes {dimension_semantics = [#tpu.dimension_semantics<parallel>], iteration_bounds = array<i64: 2>, scalar_prefetch = 0 : i64, scratch_operands = 0 : i64, tpu.core_type = #tpu.core_type<tc>, window_params = [{pipeline_mode = #tpu.pipeline_mode<synchronous>, transform_indices = @transform_0, window_bounds = array<i64: 2, 1920>}, {transform_indices = @transform_1, window_bounds = array<i64: 8, 1920>}, {transform_indices = @transform_2, window_bounds = array<i64: 8, 1920>}]} {
    %c0 = arith.constant 0 : index
    %c0_0 = arith.constant 0 : index
    %0 = vector.load %arg2[%c0, %c0_0] : memref<8x1920xf32, #tpu.memory_space<vmem>>, vector<8x1920xf32>
    %c0_1 = arith.constant 0 : index
    %c0_2 = arith.constant 0 : index
    %1 = vector.load %arg1[%c0_1, %c0_2] : memref<2x1920xf32, #tpu.memory_space<vmem>>, vector<1x1920xf32>
    %c1 = arith.constant 1 : index
    %c0_3 = arith.constant 0 : index
    %2 = vector.load %arg1[%c1, %c0_3] : memref<2x1920xf32, #tpu.memory_space<vmem>>, vector<1x1920xf32>
    %3 = vector.broadcast %1 : vector<1x1920xf32> to vector<8x1920xf32>
    %4 = arith.mulf %0, %3 : vector<8x1920xf32>
    %5 = vector.broadcast %2 : vector<1x1920xf32> to vector<8x1920xf32>
    %6 = arith.addf %4, %5 : vector<8x1920xf32>
    %7 = math.sin %6 : vector<8x1920xf32>
    %c0_4 = arith.constant 0 : index
    %c0_5 = arith.constant 0 : index
    %8 = vector.load %arg3[%c0_4, %c0_5] : memref<8x1920xf32, #tpu.memory_space<vmem>>, vector<8x1920xf32>
    tpu.vector_store %arg3[%c0_4, %c0_5], %7 {strides = array<i32>} : memref<8x1920xf32, #tpu.memory_space<vmem>>, vector<8x1920xf32>,
    return
  }
  func.func @transform_0(%arg0: i32) -> (i32, i32) {
    %c0_i32 = arith.constant 0 : i32
    %c0_i32_0 = arith.constant 0 : i32
    %c0_i32_1 = arith.constant 0 : i32
    return %c0_i32, %c0_i32_0 : i32, i32
  }
  func.func @transform_1(%arg0: i32) -> (i32, i32) {
    %c0_i32 = arith.constant 0 : i32
    %c0_i32_0 = arith.constant 0 : i32
    return %arg0, %c0_i32 : i32, i32
  }
  func.func @transform_2(%arg0: i32) -> (i32, i32) {
    %c0_i32 = arith.constant 0 : i32
    %c0_i32_0 = arith.constant 0 : i32
    return %arg0, %c0_i32 : i32, i32
  }
}

</mosaic_0001>

<bundles_post_ra>
// kernel: _encode_impl.1
= control target key start
LH: loop header
LB: loop body
LE: loop exit
PB: predicated region body
PF: predicated region fallthrough
CT: control target
= control target key end

     0   :  { %s2216_s9 = smov 0   ;;  %s3494_s0 = inlined_call_operand.vmem [shape: f32[2,1920], index: 0, kind: input, shape index: {}]   ;;  %s3495_s1 = inlined_call_operand.vmem [shape: f32[16,1920], index: 1, kind: input, shape index: {}]   ;;  %s3496_s2 = inlined_call_operand.vmem [shape: f32[16,1920], index: 2, kind: output, shape index: {}]  }
   0x1 LB: > { %s1980_s10 = sadd.s32 4294967295, %s2193_s9   ;;  %p1984_p0 = scmp.ge.s32.totalorder %s2193_s9, 1  ;;  %s2193_s9 = sphi %s2216_s9, %s12_s9  }
   0x2   : > { %p112_p1 = scmp.lt.s32.totalorder %s2193_s9, 3 }
   0x4   : > { %p113_p2 = pnand %p1984_p0, %p112_p1 }
   0x5   : > { %p134_p3 = scmp.lt.s32.totalorder (!%p113_p2), %s1980_s10, 1  ;;  %v168_v0 = vlaneseq (!%p113_p2)  ;;  %v2231_v2 = vld [vmem:[%s3494_s0] ss:$2 sm:$0xff] (!%p113_p2)  ;;  %v1987_v7 = vld [vmem:[%s3494_s0 + $0x10] ss:$2 sm:$0xff] (!%p113_p2) }
   0x6   : > { %116 = sbr.rel (%p113_p2) target bundleno = 434 (0x1b2), region = 28  ;;  %v2284_v22 = vld [vmem:[%s3494_s0 + $0x1] ss:$2 sm:$0xff] (!%p113_p2)  ;;  %v1989_v48 = vld [vmem:[%s3494_s0 + $0x11] ss:$2 sm:$0xff] (!%p113_p2) }
   0x7   : > { %v2226_v1 = vshrl.u32 (!%p113_p2), %v168_v0, 7 }
   0x9   : > { %v2235_v3 = vsub.s32 (!%p113_p2), 0, %v2226_v1  ;;  %v2238_v4 = vsub.s32 (!%p113_p2), 1, %v2226_v1  ;;  %v2241_v5 = vsub.s32 (!%p113_p2), 2, %v2226_v1  ;;  %v2244_v6 = vsub.s32 (!%p113_p2), 3, %v2226_v1 }
   0xa   : > { %v2250_v8 = vsub.s32 (!%p113_p2), 4, %v2226_v1  ;;  %v2253_v9 = vsub.s32 (!%p113_p2), 5, %v2226_v1  ;;  %v2256_v10 = vsub.s32 (!%p113_p2), 6, %v2226_v1  ;;  %v198_v11 = vsub.s32 (!%p113_p2), 7, %v2226_v1 }
   0xb   : > { %v171_v12 = vrot.slane (!%p113_p2), %v2231_v2, %v2235_v3  ;;  %v175_v13 = vrot.slane (!%p113_p2), %v2231_v2, %v2238_v4  ;;  %v203_v23 = vrot.slane (!%p113_p2), %v1987_v7, %v2235_v3  ;;  %v207_v24 = vrot.slane (!%p113_p2), %v1987_v7, %v2238_v4 }
   0xc   : > { %v187_v16 = vrot.slane (!%p113_p2), %v2231_v2, %v2250_v8  ;;  %v191_v17 = vrot.slane (!%p113_p2), %v2231_v2, %v2253_v9  ;;  %v195_v18 = vrot.slane (!%p113_p2), %v2231_v2, %v2256_v10  ;;  %v199_v19 = vrot.slane (!%p113_p2), %v2231_v2, %v198_v11 }
   0xd   : > { %s3524_s10 = smov (!%p134_p3, %s1980_s10), 1  ;;  %v211_v25 = vrot.slane %v1987_v7, %v2241_v5  ;;  %v215_v26 = vrot.slane %v1987_v7, %v2244_v6  ;;  %v219_v31 = vrot.slane %v1987_v7, %v2250_v8  ;;  %v223_v32 = vrot.slane %v1987_v7, %v2253_v9 }
   0xe   : > { %s2052_s13 = smul.u32 120, %s3524_s10  ;;  %v227_v33 = vrot.slane %v1987_v7, %v2256_v10  ;;  %v179_v37 = vrot.slane %v2231_v2, %v2241_v5  ;;  %v263_v55 = vrot.slane %v2284_v22, %v2235_v3  ;;  %v267_v56 = vrot.slane %v2284_v22, %v2238_v4 }
   0xf   : > { %v271_v58 = vrot.slane %v2284_v22, %v2241_v5  ;;  %v279_v59 = vrot.slane %v2284_v22, %v2250_v8  ;;  %v283_v60 = vrot.slane %v2284_v22, %v2253_v9  ;;  %v287_v61 = vrot.slane %v2284_v22, %v2256_v10 }
  0x10   : > { %s2264_s18 = scalar_lea.vmem %s3495_s1, %s2052_s13  ;;  %v291_v62 = vrot.slane %v2284_v22, %v198_v11  ;;  %v295_v63 = vrot.slane %v1989_v48, %v2235_v3  ;;  %v299_v0 = vrot.slane %v1989_v48, %v2238_v4  ;;  %v303_v1 = vrot.slane %v1989_v48, %v2241_v5  ;;  %s2636_s25 = scalar_lea.vmem %s3496_s2, %s2052_s13 }
  0x11   : > { %v144_v14 = vld [vmem:[%s2264_s18] sm:$0xff]  ;;  %v145_v15 = vld [vmem:[%s2264_s18 + $0x8] sm:$0xff]  ;;  %v146_v27 = vld [vmem:[%s2264_s18 + $0x10] sm:$0xff]  ;;  %v307_v7 = vrot.slane %v1989_v48, %v2244_v6 }
  0x12   : > { %v148_v20 = vld [vmem:[%s2264_s18 + $0x20] sm:$0xff]  ;;  %v149_v21 = vld [vmem:[%s2264_s18 + $0x28] sm:$0xff]  ;;  %v150_v28 = vld [vmem:[%s2264_s18 + $0x30] sm:$0xff]  ;;  %v243_v38 = vmul.f32 %v171_v12, %v144_v14  ;;  %v244_v39 = vmul.f32 %v175_v13, %v145_v15  ;;  %v245_v57 = vmul.f32 %v179_v37, %v146_v27  ;;  %v311_v12 = vrot.slane %v1989_v48, %v2250_v8 }
  0x13   : > { %v151_v29 = vld [vmem:[%s2264_s18 + $0x38] sm:$0xff]  ;;  %v152_v30 = vld [vmem:[%s2264_s18 + $0x40] sm:$0xff]  ;;  %v153_v34 = vld [vmem:[%s2264_s18 + $0x48] sm:$0xff]  ;;  %v247_v40 = vmul.f32 %v187_v16, %v148_v20  ;;  %v248_v44 = vmul.f32 %v191_v17, %v149_v21  ;;  %v249_v45 = vmul.f32 %v195_v18, %v150_v28  ;;  %v315_v13 = vrot.slane %v1989_v48, %v2253_v9 }
  0x14   : > { %v154_v35 = vld [vmem:[%s2264_s18 + $0x50] sm:$0xff]  ;;  %v155_v36 = vld [vmem:[%s2264_s18 + $0x58] sm:$0xff]  ;;  %v156_v41 = vld [vmem:[%s2264_s18 + $0x60] sm:$0xff]  ;;  %v250_v46 = vmul.f32 %v199_v19, %v151_v29  ;;  %v251_v47 = vmul.f32 %v203_v23, %v152_v30  ;;  %v252_v49 = vmul.f32 %v207_v24, %v153_v34  ;;  %v319_v14 = vrot.slane %v1989_v48, %v2256_v10 }
  0x15   : > { %v157_v42 = vld [vmem:[%s2264_s18 + $0x68] sm:$0xff]  ;;  %v158_v43 = vld [vmem:[%s2264_s18 + $0x70] sm:$0xff]  ;;  %v253_v50 = vmul.f32 %v211_v25, %v154_v35  ;;  %v254_v51 = vmul.f32 %v215_v26, %v155_v36  ;;  %v255_v52 = vmul.f32 %v219_v31, %v156_v41  ;;  %v2328_v15 = vadd.f32 %v263_v55, %v243_v38  ;;  %v147_v28 = vld [vmem:[%s2264_s18 + $0x18] sm:$0xff] }
  0x16   : > { %v256_v53 = vmul.f32 %v223_v32, %v157_v42  ;;  %v257_v54 = vmul.f32 %v227_v33, %v158_v43  ;;  %v2330_v16 = vadd.f32 %v267_v56, %v244_v39  ;;  %v2332_v17 = vadd.f32 %v271_v58, %v245_v57 }
  0x17   : > { %v2334_v11 = vadd.f32 %v279_v59, %v247_v40  ;;  %v2336_v3 = vadd.f32 %v283_v60, %v248_v44  ;;  %v2338_v4 = vadd.f32 %v287_v61, %v249_v45  ;;  %v2340_v5 = vadd.f32 %v291_v62, %v250_v46 }
  0x18   : > { %v2342_v8 = vadd.f32 %v295_v63, %v251_v47  ;;  %v2344_v9 = vadd.f32 %v299_v0, %v252_v49  ;;  %v2346_v10 = vadd.f32 %v303_v1, %v253_v50  ;;  %v2348_v18 = vadd.f32 %v307_v7, %v254_v51 }
  0x19   : > { %v2350_v19 = vadd.f32 %v311_v12, %v255_v52  ;;  %v2352_v20 = vadd.f32 %v315_v13, %v256_v53  ;;  %v2354_v21 = vadd.f32 %v319_v14, %v257_v54  ;;  %v350_v23 = vand.u32 2147483647, %v2328_v15 }
  0x1a   : > { %v353_v24 = vand.u32 2139095040, %v2328_v15  ;;  %v183_v25 = vrot.slane %v2231_v2, %v2244_v6  ;;  %v454_v26 = vand.u32 2147483647, %v2330_v16  ;;  %v457_v27 = vand.u32 2139095040, %v2330_v16 }
  0x1b   : > { %v357_v30 = vand.u32 8388607, %v350_v23  ;;  %v561_v33 = vand.u32 2139095040, %v2332_v17  ;;  %v275_v2 = vrot.slane %v2284_v22, %v2244_v6  ;;  %v558_v42 = vand.u32 2147483647, %v2332_v17 }
  0x1c   : > { %v354_v29 = vshrl.u32 %v353_v24, 23  ;;  %v458_v31 = vshrl.u32 %v457_v27, 23  ;;  %v461_v32 = vand.u32 8388607, %v454_v26  ;;  %v246_v35 = vmul.f32 %v183_v25, %v147_v28 }
  0x1d   : > { %v562_v37 = vshrl.u32 %v561_v33, 23  ;;  %v358_v38 = vor.u32 8388608, %v357_v30  ;;  %v2379_v50 = vand.u32 8388607, %v558_v42  ;;  %v2195_v53 = vmov 683565275  }
  0x1e   : > { %v1990_v34 = vadd.s32 4294967169, %v354_v29  ;;  %v1994_v36 = vadd.s32 4294967169, %v458_v31  ;;  %v462_v40 = vor.u32 8388608, %v461_v32  ;;  %v2371_v44 = vadd.f32 %v275_v2, %v246_v35 }
  0x1f   : > { %v1998_v43 = vadd.s32 4294967169, %v562_v37  ;;  %v2373_v48 = vshll.u32 %v358_v38, 8  ;;  %v2196_v55 = vmov 2475754826   ;;  %v2197_v57 = vmov 2131351028  }
  0x20   : > { %v360_v39 = vadd.s32 1, %v1990_v34  ;;  %v464_v41 = vadd.s32 1, %v1994_v36  ;;  %v2375_v22 = vshll.u32 %v462_v40, 8  ;;  %v2198_v59 = vmov 2102212464  }
  0x21   : > { %v2381_v51 = vadd.s32 1, %v1998_v43  ;;  %v2199_v61 = vmov 920167782   ;;  %v2200_v14 = vmov 1326507024   ;;  %vm352_vm12 = vcmp.lt.s32.totalorder %v2328_v15, 0 }
  0x22   : > { %vm361_vm0 = vcmp.gt.s32.totalorder %v360_v39, 0  ;;  %vm465_vm1 = vcmp.gt.s32.totalorder %v464_v41, 0  ;;  %vm2466_vm14 = vcmp.le.f32.partialorder %v350_v23, 0.7853982 }
  0x23   : > { %v362_v45 = vsel %vm361_vm0, %v360_v39, 0  ;;  %v466_v49 = vsel %vm465_vm1, %v464_v41, 0  ;;  %vm569_vm6 = vcmp.gt.s32.totalorder %v2381_v51, 0 }
  0x24   : > { %v363_v46 = vshrl.u32 %v362_v45, 5  ;;  %v364_v47 = vand.u32 31, %v362_v45  ;;  %v468_v6 = vand.u32 31, %v466_v49  ;;  %v2388_v63 = vshrl.u32 %v466_v49, 5 }
  0x26   : > { %v365_v52 = vsub.s32 32, %v364_v47  ;;  %v367_v54 = vshll.u32 %v2195_v53, %v364_v47  ;;  %v370_v56 = vshll.u32 %v2196_v55, %v364_v47  ;;  %v373_v58 = vshll.u32 %v2197_v57, %v364_v47 }
  0x27   : > { %v376_v60 = vshll.u32 %v2198_v59, %v364_v47  ;;  %v379_v62 = vshll.u32 %v2199_v61, %v364_v47  ;;  %vm382_vm2 = vcmp.lt.s32.totalorder %v363_v46, 1  ;;  %vm383_vm3 = vcmp.lt.s32.totalorder %v363_v46, 2 }
  0x28   : > { %v366_v0 = vshrl.u32 %v2195_v53, %v365_v52  ;;  %v368_v1 = vshrl.u32 %v2196_v55, %v365_v52  ;;  %v371_v7 = vshrl.u32 %v2197_v57, %v365_v52  ;;  %v374_v12 = vshrl.u32 %v2198_v59, %v365_v52 }
  0x29   : > { %v377_v13 = vshrl.u32 %v2199_v61, %v365_v52  ;;  %v380_v24 = vshrl.u32 %v2200_v14, %v365_v52  ;;  %vm385_vm4 = vcmp.lt.s32.totalorder %v363_v46, 4  ;;  %v469_v29 = vsub.s32 32, %v468_v6 }
  0x2a   : > { %v369_v25 = vor.u32 %v368_v1, %v367_v54  ;;  %v372_v27 = vor.u32 %v371_v7, %v370_v56  ;;  %v375_v28 = vor.u32 %v374_v12, %v373_v58  ;;  %vm384_vm5 = vcmp.lt.s32.totalorder %v363_v46, 3 }
  0x2b   : > { %v378_v30 = vor.u32 %v377_v13, %v376_v60  ;;  %v381_v31 = vor.u32 %v380_v24, %v379_v62  ;;  %v471_v32 = vshll.u32 %v2195_v53, %v468_v6  ;;  %v474_v39 = vshll.u32 %v2196_v55, %v468_v6 }
  0x2c   : > { %v386_v33 = vsel %vm382_vm2, %v366_v0, %v369_v25  ;;  %v387_v34 = vsel %vm385_vm4, %v375_v28, 2102212464  ;;  %v390_v35 = vsel %vm382_vm2, %v369_v25, %v372_v27  ;;  %v394_v2 = vsel %vm382_vm2, %v372_v27, %v375_v28 }
  0x2d   : > { %v388_v36 = vsel %vm384_vm5, %v372_v27, %v387_v34  ;;  %v391_v37 = vsel %vm385_vm4, %v378_v30, 920167782  ;;  %v395_v38 = vsel %vm385_vm4, %v381_v31, 1326507024  ;;  %v470_v43 = vshrl.u32 %v2195_v53, %v469_v29 }
  0x2e   : > { %v392_v40 = vsel %vm384_vm5, %v375_v28, %v391_v37  ;;  %v396_v41 = vsel %vm384_vm5, %v378_v30, %v395_v38  ;;  %v472_v45 = vshrl.u32 %v2196_v55, %v469_v29  ;;  %v389_v47 = vsel %vm383_vm3, %v386_v33, %v388_v36 }
  0x2f   : > { %v393_v49 = vsel %vm383_vm3, %v390_v35, %v392_v40  ;;  %v397_v52 = vsel %vm383_vm3, %v394_v2, %v396_v41  ;;  %v475_v54 = vshrl.u32 %v2197_v57, %v469_v29  ;;  %v477_v7 = vshll.u32 %v2197_v57, %v468_v6 }
  0x30   : > { %v2409_v56 = vmul.u32.u64.low %v2373_v48, %v397_v52  ;;  %v2410_v58 = vmul.u32.u64.high %v2373_v48, %v397_v52, %v2409_v56  ;;  %v2413_v60 = vmul.u32.u64.low %v2373_v48, %v393_v49  ;;  %v2414_v62 = vmul.u32.u64.high %v2373_v48, %v393_v49, %v2413_v60 }
  0x31   : > { %v473_v0 = vor.u32 %v472_v45, %v471_v32  ;;  %v476_v1 = vor.u32 %v475_v54, %v474_v39  ;;  %v478_v12 = vshrl.u32 %v2198_v59, %v469_v29  ;;  %v480_v46 = vshll.u32 %v2198_v59, %v468_v6 }
  0x32   : > { %v481_v13 = vshrl.u32 %v2199_v61, %v469_v29  ;;  %v483_v24 = vshll.u32 %v2199_v61, %v468_v6  ;;  %v484_v25 = vshrl.u32 %v2200_v14, %v469_v29  ;;  %v405_v27 = vmul.u32 %v2373_v48, %v389_v47 }
  0x33   : > { %v479_v28 = vor.u32 %v478_v12, %v477_v7  ;;  %vm486_vm7 = vcmp.lt.s32.totalorder %v2388_v63, 1  ;;  %vm487_vm8 = vcmp.lt.s32.totalorder %v2388_v63, 2  ;;  %vm407_vm9 = vc.u32 %v2410_v58, %v2413_v60 }
  0x34   : > { %v408_v30 = vadd.s32 1, %v2414_v62  ;;  %v482_v31 = vor.u32 %v481_v13, %v480_v46  ;;  %vm488_vm10 = vcmp.lt.s32.totalorder %v2388_v63, 3  ;;  %v485_v32 = vor.u32 %v484_v25, %v483_v24 }
  0x35   : > { %vm489_vm11 = vcmp.lt.s32.totalorder %v2388_v63, 4  ;;  %v490_v6 = vsel %vm486_vm7, %v470_v43, %v473_v0  ;;  %v494_v29 = vsel %vm486_vm7, %v473_v0, %v476_v1  ;;  %v498_v35 = vsel %vm486_vm7, %v476_v1, %v479_v28 }
  0x36   : > { %v409_v48 = vsel %vm407_vm9, %v408_v30, %v2414_v62  ;;  %v491_v33 = vsel %vm489_vm11, %v479_v28, 2102212464  ;;  %v495_v34 = vsel %vm489_vm11, %v482_v31, 920167782  ;;  %v499_v38 = vsel %vm489_vm11, %v485_v32, 1326507024 }
  0x37   : > { %v410_v2 = vadd.s32 %v409_v48, %v405_v27  ;;  %v492_v36 = vsel %vm488_vm10, %v476_v1, %v491_v33  ;;  %v496_v37 = vsel %vm488_vm10, %v479_v28, %v495_v34  ;;  %v500_v41 = vsel %vm488_vm10, %v482_v31, %v499_v38 }
  0x38   : > { %v493_v39 = vsel %vm487_vm8, %v490_v6, %v492_v36  ;;  %v497_v40 = vsel %vm487_vm8, %v494_v29, %v496_v37  ;;  %v570_v43 = vsel %vm569_vm6, %v2381_v51, 0  ;;  %v501_v47 = vsel %vm487_vm8, %v498_v35, %v500_v41 }
  0x39   : > { %v411_v45 = vadd.s32 536870912, %v410_v2  ;;  %v2442_v49 = vmul.u32.u64.low %v2375_v22, %v497_v40  ;;  %v2443_v52 = vmul.u32.u64.high %v2375_v22, %v497_v40, %v2442_v49  ;;  %v566_v62 = vor.u32 8388608, %v2379_v50 }
  0x3a   : > { %v2447_v54 = vmul.u32.u64.low %v2375_v22, %v501_v47  ;;  %v2448_v56 = vmul.u32.u64.high %v2375_v22, %v501_v47, %v2447_v54  ;;  %v662_v0 = vand.u32 2147483647, %v2371_v44  ;;  %v572_v7 = vand.u32 31, %v570_v43 }
  0x3b   : > { %v412_v1 = vshrl.u32 %v411_v45, 30  ;;  %v509_v51 = vmul.u32 %v2375_v22, %v493_v39  ;;  %v512_v12 = vadd.s32 1, %v2443_v52  ;;  %v2457_v13 = vshll.u32 %v566_v62, 8 }
  0x3c   : > { %v573_v46 = vsub.s32 32, %v572_v7  ;;  %vm511_vm13 = vc.u32 %v2448_v56, %v2442_v49  ;;  %v665_v24 = vand.u32 2139095040, %v2371_v44  ;;  %v2462_v50 = vand.u32 8388607, %v662_v0 }
  0x3d   : > { %v413_v63 = vshll.u32 %v412_v1, 30  ;;  %v436_v27 = vsub.s32 4, %v412_v1  ;;  %v513_v28 = vsel %vm511_vm13, %v512_v12, %v2443_v52  ;;  %v571_v30 = vshrl.u32 %v570_v43, 5 }
  0x3e   : > { %v514_v31 = vadd.s32 %v513_v28, %v509_v51  ;;  %v575_v32 = vshll.u32 %v2195_v53, %v572_v7  ;;  %v576_v6 = vshrl.u32 %v2196_v55, %v573_v46  ;;  %v578_v29 = vshll.u32 %v2196_v55, %v572_v7 }
  0x3f   : > { %v2470_v25 = vsub.s32 %v410_v2, %v413_v63  ;;  %v579_v23 = vshrl.u32 %v2197_v57, %v573_v46  ;;  %v581_v33 = vshll.u32 %v2197_v57, %v572_v7  ;;  %v582_v34 = vshrl.u32 %v2198_v59, %v573_v46 }
  0x40   : > { %v406_v35 = vadd.s32 %v2413_v60, %v2410_v58  ;;  %v515_v2 = vadd.s32 536870912, %v514_v31  ;;  %v584_v36 = vshll.u32 %v2198_v59, %v572_v7  ;;  %v666_v37 = vshrl.u32 %v665_v24, 23 }
  0x41   : > { %v416_v48 = vsub.s32 0, %v2470_v25  ;;  %v437_v39 = vsel %vm352_vm12, %v436_v27, %v412_v1  ;;  %v585_v40 = vshrl.u32 %v2199_v61, %v573_v46  ;;  %vm593_vm15 = vcmp.lt.s32.totalorder %v571_v30, 4 }
  0x42   : > { %v2487_v41 = vshrl.u32 %v515_v2, 30  ;;  %v574_v43 = vshrl.u32 %v2195_v53, %v573_v46  ;;  %v587_v45 = vshll.u32 %v2199_v61, %v572_v7  ;;  %v588_v58 = vshrl.u32 %v2200_v14, %v573_v46 }
  0x43   : > { %v1991_v38 = vmin.u32 %v416_v48, %v2470_v25  ;;  %v577_v47 = vor.u32 %v576_v6, %v575_v32  ;;  %v580_v52 = vor.u32 %v579_v23, %v578_v29  ;;  %v583_v54 = vor.u32 %v582_v34, %v581_v33 }
  0x44   : > { %v517_v62 = vshll.u32 %v2487_v41, 30  ;;  %v586_v51 = vor.u32 %v585_v40, %v584_v36  ;;  %vm590_vm0 = vcmp.lt.s32.totalorder %v571_v30, 1  ;;  %vm592_vm1 = vcmp.lt.s32.totalorder %v571_v30, 3 }
  0x45   : > { %v418_v60 = vclz %v1991_v38  ;;  %v589_v63 = vor.u32 %v588_v58, %v587_v45  ;;  %v595_v12 = vsel %vm593_vm15, %v583_v54, 2102212464  ;;  %v2002_v24 = vadd.s32 4294967169, %v666_v37 }
  0x46   : > { %v439_v27 = vsel %vm2466_vm14, 0, %v437_v39  ;;  %v2496_v7 = vsub.s32 %v514_v31, %v517_v62  ;;  %vm591_vm2 = vcmp.lt.s32.totalorder %v571_v30, 2  ;;  %v599_v46 = vsel %vm593_vm15, %v586_v51, 920167782 }
  0x47   : > { %v1992_v1 = vadd.s32 4294967294, %v418_v60  ;;  %v594_v28 = vsel %vm590_vm0, %v574_v43, %v577_v47  ;;  %v598_v32 = vsel %vm590_vm0, %v577_v47, %v580_v52  ;;  %v600_v6 = vsel %vm592_vm1, %v583_v54, %v599_v46 }
  0x48   : > { %v520_v48 = vsub.s32 0, %v2496_v7  ;;  %v596_v23 = vsel %vm592_vm1, %v580_v52, %v595_v12  ;;  %v602_v33 = vsel %vm590_vm0, %v580_v52, %v583_v54  ;;  %v603_v36 = vsel %vm593_vm15, %v589_v63, 1326507024 }
  0x49   : > { %vm1993_vm3 = vcmp.lt.s32.totalorder %v1992_v1, 0  ;;  %vm456_vm4 = vcmp.lt.s32.totalorder %v2330_v16, 0  ;;  %v601_v38 = vsel %vm591_vm2, %v598_v32, %v600_v6  ;;  %v604_v39 = vsel %vm592_vm1, %v586_v51, %v603_v36 }
  0x4a   : > { %v421_v29 = vsel %vm1993_vm3, 0, %v1992_v1  ;;  %v1995_v37 = vmin.u32 %v520_v48, %v2496_v7  ;;  %v605_v45 = vsel %vm591_vm2, %v602_v33, %v604_v39  ;;  %v672_v58 = vadd.s32 1, %v2002_v24 }
  0x4b   : > { %v422_v34 = vsub.s32 32, %v421_v29  ;;  %v423_v31 = vshll.u32 %v2470_v25, %v421_v29  ;;  %v426_v2 = vsub.s32 4294967266, %v421_v29  ;;  %v443_v60 = vadd.s32 3, %v439_v27 }
  0x4c   : > { %v522_v47 = vclz %v1995_v37  ;;  %v597_v25 = vsel %vm591_vm2, %v594_v28, %v596_v23  ;;  %v670_v52 = vor.u32 8388608, %v2462_v50  ;;  %vm673_vm5 = vcmp.gt.s32.totalorder %v672_v58, 0 }
  0x4d   : > { %v424_v40 = vshrl.u32 %v406_v35, %v422_v34  ;;  %v427_v43 = vadd.s32 127, %v426_v2  ;;  %v2515_v1 = vmul.u32.u64.low %v2457_v13, %v605_v45  ;;  %v2516_v63 = vmul.u32.u64.high %v2457_v13, %v605_v45, %v2515_v1 }
  0x4e   : > { %v1996_v12 = vadd.s32 4294967294, %v522_v47  ;;  %v2519_v51 = vmul.u32.u64.low %v2457_v13, %v601_v38  ;;  %v2520_v35 = vmul.u32.u64.high %v2457_v13, %v601_v38, %v2519_v51  ;;  %v540_v30 = vsub.s32 4, %v2487_v41 }
  0x4f   : > { %v425_v54 = vor.u32 %v424_v40, %v423_v31  ;;  %v428_v62 = vshll.u32 %v427_v43, 23  ;;  %v674_v46 = vsel %vm673_vm5, %v672_v58, 0  ;;  %v2524_v28 = vand.u32 3, %v443_v60 }
  0x50   : > { %v510_v32 = vadd.s32 %v2442_v49, %v2448_v56  ;;  %vm1997_vm6 = vcmp.lt.s32.totalorder %v1996_v12, 0  ;;  %v676_v6 = vand.u32 31, %v674_v46  ;;  %v613_v23 = vmul.u32 %v2457_v13, %v597_v25 }
  0x51   : > { %v429_v24 = vor.u32 4788187, %v428_v62  ;;  %v432_v27 = vcvt.s32.f32 %v425_v54  ;;  %v525_v48 = vsel %vm1997_vm6, 0, %v1996_v12  ;;  %vm615_vm7 = vc.u32 %v2516_v63, %v2519_v51 }
  0x52   : > { %vm2533_vm8 = vcmp.le.f32.partialorder %v454_v26, 0.7853982  ;;  %v526_v34 = vsub.s32 32, %v525_v48  ;;  %v527_v31 = vshll.u32 %v2496_v7, %v525_v48  ;;  %v530_v2 = vsub.s32 4294967266, %v525_v48 }
  0x53   : > { %v430_v29 = vand.u32 2147483647, %v429_v24  ;;  %v616_v49 = vadd.s32 1, %v2520_v35  ;;  %v541_v13 = vsel %vm456_vm4, %v540_v30, %v2487_v41  ;;  %v2542_v36 = vshrl.u32 %v674_v46, 5 }
  0x54   : > { %v677_v37 = vsub.s32 32, %v676_v6  ;;  %v528_v38 = vshrl.u32 %v510_v32, %v526_v34  ;;  %v531_v39 = vadd.s32 127, %v530_v2  ;;  %v679_v40 = vshll.u32 %v2195_v53, %v676_v6 }
  0x55   : > { %v433_v56 = vmul.f32 %v432_v27, %v430_v29  ;;  %v617_v26 = vsel %vm615_vm7, %v616_v49, %v2520_v35  ;;  %v682_v58 = vshll.u32 %v2196_v55, %v676_v6  ;;  %v685_v41 = vshll.u32 %v2197_v57, %v676_v6 }
  0x56   : > { %v618_v45 = vadd.s32 %v617_v26, %v613_v23  ;;  %v680_v7 = vshrl.u32 %v2196_v55, %v677_v37  ;;  %v529_v60 = vor.u32 %v528_v38, %v527_v31  ;;  %v532_v47 = vshll.u32 %v531_v39, 23 }
  0x57   : > { %v434_v43 = vxor.u32 2147483648, %v433_v56  ;;  %v683_v25 = vshrl.u32 %v2197_v57, %v677_v37  ;;  %v686_v1 = vshrl.u32 %v2198_v59, %v677_v37  ;;  %v688_v12 = vshll.u32 %v2198_v59, %v676_v6 }
  0x58   : > { %v619_v62 = vadd.s32 536870912, %v618_v45  ;;  %v533_v24 = vor.u32 4788187, %v532_v47  ;;  %v536_v27 = vcvt.s32.f32 %v529_v60  ;;  %v681_v30 = vor.u32 %v680_v7, %v679_v40 }
  0x59   : > { %v435_v54 = vsel %vm352_vm12, %v434_v43, %v433_v56  ;;  %v684_v32 = vor.u32 %v683_v25, %v682_v58  ;;  %v689_v29 = vshrl.u32 %v2199_v61, %v677_v37  ;;  %v691_v23 = vshll.u32 %v2199_v61, %v676_v6 }
  0x5a   : > { %v438_v35 = vsel %vm2466_vm14, %v2328_v15, %v435_v54  ;;  %v2557_v46 = vshrl.u32 %v619_v62, 30  ;;  %v534_v48 = vand.u32 2147483647, %v533_v24  ;;  %v692_v34 = vshrl.u32 %v2200_v14, %v677_v37 }
  0x5b   : > { %2127 = vcosq.f32 %v438_v35  ;;  %v543_v31 = vsel %vm2533_vm8, 0, %v541_v13  ;;  %v690_v2 = vor.u32 %v689_v29, %v688_v12  ;;  %vm694_vm9 = vcmp.lt.s32.totalorder %v2542_v36, 1 }
  0x5c   : > { %2129 = vsinq.f32 %v438_v35  ;;  %v621_v22 = vshll.u32 %v2557_v46, 30  ;;  %v537_v49 = vmul.f32 %v536_v27, %v534_v48  ;;  %v678_v56 = vshrl.u32 %v2195_v53, %v677_v37 }
  0x5d   : > { %v687_v38 = vor.u32 %v686_v1, %v685_v41  ;;  %v2569_v39 = vshll.u32 %v670_v52, 8  ;;  %vm445_vm10 = vcmp.lt.s32.totalorder %v2524_v28, 2  ;;  %v693_v26 = vor.u32 %v692_v34, %v691_v23 }
  0x5e   : > { %v2572_v6 = vsub.s32 %v618_v45, %v621_v22  ;;  %vm696_vm11 = vcmp.lt.s32.totalorder %v2542_v36, 3  ;;  %vm697_vm12 = vcmp.lt.s32.totalorder %v2542_v36, 4  ;;  %vm442_vm13 = vweird.f32 %v2328_v15 }
  0x5f   : > { %v538_v13 = vxor.u32 2147483648, %v537_v49  ;;  %vm560_vm14 = vcmp.lt.s32.totalorder %v2332_v17, 0  ;;  %vm695_vm15 = vcmp.lt.s32.totalorder %v2542_v36, 2  ;;  %v699_v50 = vsel %vm697_vm12, %v687_v38, 2102212464 }
  0x60   : > { %v702_v52 = vsel %vm694_vm9, %v681_v30, %v684_v32  ;;  %vm446_vm0 = vcmp.eq.s32.totalorder %v2524_v28, 0  ;;  %v547_v37 = vadd.s32 3, %v543_v31  ;;  %v624_v40 = vsub.s32 0, %v2572_v6 }
  0x61   : > { %v703_v43 = vsel %vm697_vm12, %v690_v2, 920167782  ;;  %v539_v45 = vsel %vm456_vm4, %v538_v13, %v537_v49  ;;  %v698_v7 = vsel %vm694_vm9, %v678_v56, %v681_v30  ;;  %v700_v58 = vsel %vm696_vm11, %v684_v32, %v699_v50 }
  0x62   : > { %v704_v60 = vsel %vm696_vm11, %v687_v38, %v703_v43  ;;  %v542_v47 = vsel %vm2533_vm8, %v2330_v16, %v539_v45  ;;  %vm2600_vm1 = vcmp.le.f32.partialorder %v558_v42, 0.7853982  ;;  %v1999_v41 = vmin.u32 %v624_v40, %v2572_v6 }
  0x63   : > { %v705_v54 = vsel %vm695_vm15, %v702_v52, %v704_v60  ;;  %v706_v62 = vsel %vm694_vm9, %v684_v32, %v687_v38  ;;  %2131 = vcosq.f32 %v542_v47  ;;  %v707_v1 = vsel %vm697_vm12, %v693_v26, 1326507024 }
  0x64   : > { %v2612_v33 = vmul.u32.u64.low %v2569_v39, %v705_v54  ;;  %v2613_v12 = vmul.u32.u64.high %v2569_v39, %v705_v54, %v2612_v33  ;;  %vm449_vm2 = vcmp.eq.s32.totalorder %v2524_v28, 2  ;;  %2133 = vsinq.f32 %v542_v47 }
  0x65   : > { %v2128_v42 = vpop.eup %2127  ;;  %v626_v35 = vclz %v1999_v41  ;;  %v644_v24 = vsub.s32 4, %v2557_v46  ;;  %v548_v32 = vand.u32 3, %v547_v37  ;;  %v614_v29 = vadd.s32 %v2519_v51, %v2516_v63 }
  0x66   : > { %v2130_v27 = vpop.eup %2129  ;;  %v450_v30 = vxor.u32 2147483648, %v2128_v42  ;;  %v708_v48 = vsel %vm696_vm11, %v690_v2, %v707_v1  ;;  %v701_v31 = vsel %vm695_vm15, %v698_v7, %v700_v58  ;;  %v766_v26 = vand.u32 2147483647, %v2334_v11 }
  0x67   : > { %v447_v23 = vxor.u32 2147483648, %v2130_v27  ;;  %v2000_v34 = vadd.s32 4294967294, %v626_v35  ;;  %v709_v22 = vsel %vm695_vm15, %v706_v62, %v708_v48  ;;  %vm546_vm3 = vweird.f32 %v2330_v16 }
  0x68   : > { %v451_v49 = vsel %vm449_vm2, %v450_v30, %v2130_v27  ;;  %v2627_v56 = vmul.u32.u64.low %v2569_v39, %v709_v22  ;;  %v2628_v38 = vmul.u32.u64.high %v2569_v39, %v709_v22, %v2627_v56  ;;  %v645_v51 = vsel %vm560_vm14, %v644_v24, %v2557_v46 }
  0x69   : > { %v448_v63 = vsel %vm446_vm0, %v2128_v42, %v447_v23  ;;  %vm2001_vm4 = vcmp.lt.s32.totalorder %v2000_v34, 0  ;;  %v720_v36 = vadd.s32 1, %v2613_v12  ;;  %v717_v50 = vmul.u32 %v2569_v39, %v701_v31 }
  0x6a   : > { %v452_v2 = vsel %vm445_vm10, %v448_v63, %v451_v49  ;;  %v629_v13 = vsel %vm2001_vm4, 0, %v2000_v34  ;;  %v769_v52 = vand.u32 2139095040, %v2334_v11  ;;  %v647_v46 = vsel %vm2600_vm1, 0, %v645_v51 }
  0x6b   : > { %v453_v37 = vsel %vm442_vm13, nan, %v452_v2  ;;  %v630_v40 = vsub.s32 32, %v629_v13  ;;  %v631_v43 = vshll.u32 %v2572_v6, %v629_v13  ;;  %v634_v45 = vsub.s32 4294967266, %v629_v13 }
  0x6c   : > { %vm719_vm5 = vc.u32 %v2628_v38, %v2612_v33  ;;  %v770_v28 = vshrl.u32 %v769_v52, 23  ;;  %v773_v7 = vand.u32 8388607, %v766_v26  ;;  %1910 = vst [vmem:[%s2636_s25] sm:$0xff] %v453_v37  ;;  %vm549_vm6 = vcmp.lt.s32.totalorder %v548_v32, 2 }
  0x6d   : > { %v632_v39 = vshrl.u32 %v614_v29, %v630_v40  ;;  %v635_v58 = vadd.s32 127, %v634_v45  ;;  %v721_v15 = vsel %vm719_vm5, %v720_v36, %v2613_v12  ;;  %v2132_v60 = vpop.eup %2131  ;;  %vm550_vm7 = vcmp.eq.s32.totalorder %v548_v32, 0 }
  0x6e   : > { %vm553_vm8 = vcmp.eq.s32.totalorder %v548_v32, 2  ;;  %v722_v6 = vadd.s32 %v721_v15, %v717_v50  ;;  %v2006_v47 = vadd.s32 4294967169, %v770_v28  ;;  %v2134_v41 = vpop.eup %2133  ;;  %v554_v54 = vxor.u32 2147483648, %v2132_v60 }
  0x6f   : > { %v633_v62 = vor.u32 %v632_v39, %v631_v43  ;;  %v636_v1 = vshll.u32 %v635_v58, 23  ;;  %v651_v42 = vadd.s32 3, %v647_v46  ;;  %v551_v35 = vxor.u32 2147483648, %v2134_v41 }
  0x70   : > { %v723_v24 = vadd.s32 536870912, %v722_v6  ;;  %v774_v27 = vor.u32 8388608, %v773_v7  ;;  %v776_v30 = vadd.s32 1, %v2006_v47  ;;  %v555_v48 = vsel %vm553_vm8, %v554_v54, %v2134_v41 }
  0x71   : > { %v637_v23 = vor.u32 4788187, %v636_v1  ;;  %v640_v29 = vcvt.s32.f32 %v633_v62  ;;  %v873_v12 = vand.u32 2139095040, %v2336_v3  ;;  %v552_v34 = vsel %vm550_vm7, %v2132_v60, %v551_v35 }
  0x72   : > { %v724_v31 = vshrl.u32 %v723_v24, 30  ;;  %vm777_vm9 = vcmp.gt.s32.totalorder %v776_v30, 0  ;;  %v870_v22 = vand.u32 2147483647, %v2336_v3  ;;  %v556_v49 = vsel %vm549_vm6, %v552_v34, %v555_v48 }
  0x73   : > { %v638_v56 = vand.u32 2147483647, %v637_v23  ;;  %v778_v63 = vsel %vm777_vm9, %v776_v30, 0  ;;  %v557_v51 = vsel %vm546_vm3, nan, %v556_v49  ;;  %v874_v2 = vshrl.u32 %v873_v12, 23 }
  0x74   : > { %v725_v36 = vshll.u32 %v724_v31, 30  ;;  %v2666_v50 = vand.u32 3, %v651_v42  ;;  %vm664_vm10 = vcmp.lt.s32.totalorder %v2371_v44, 0  ;;  %v780_v52 = vand.u32 31, %v778_v63  ;;  %1911 = vst [vmem:[%s2636_s25 + $0x8] sm:$0xff] %v557_v51 }
  0x75   : > { %v641_v13 = vmul.f32 %v640_v29, %v638_v56  ;;  %v718_v37 = vadd.s32 %v2612_v33, %v2628_v38  ;;  %v2674_v32 = vshll.u32 %v774_v27, 8  ;;  %v2678_v16 = vand.u32 8388607, %v870_v22 }
  0x76   : > { %v2672_v40 = vsub.s32 %v722_v6, %v725_v36  ;;  %v748_v45 = vsub.s32 4, %v724_v31  ;;  %v2680_v46 = vshrl.u32 %v778_v63, 5  ;;  %v781_v28 = vsub.s32 32, %v780_v52 }
  0x77   : > { %v642_v43 = vxor.u32 2147483648, %v641_v13  ;;  %v783_v39 = vshll.u32 %v2195_v53, %v780_v52  ;;  %v786_v58 = vshll.u32 %v2196_v55, %v780_v52  ;;  %v2010_v33 = vadd.s32 4294967169, %v874_v2 }
  0x78   : > { %v728_v7 = vsub.s32 0, %v2672_v40  ;;  %v784_v15 = vshrl.u32 %v2196_v55, %v781_v28  ;;  %v787_v60 = vshrl.u32 %v2197_v57, %v781_v28  ;;  %v789_v6 = vshll.u32 %v2197_v57, %v780_v52 }
  0x79   : > { %v643_v38 = vsel %vm560_vm14, %v642_v43, %v641_v13  ;;  %v790_v54 = vshrl.u32 %v2198_v59, %v781_v28  ;;  %v878_v62 = vor.u32 8388608, %v2678_v16  ;;  %v2698_v1 = vsel %vm664_vm10, %v748_v45, %v724_v31 }
  0x7a   : > { %v646_v47 = vsel %vm2600_vm1, %v2332_v17, %v643_v38  ;;  %v2003_v41 = vmin.u32 %v728_v7, %v2672_v40  ;;  %v782_v42 = vshrl.u32 %v2195_v53, %v781_v28  ;;  %v792_v35 = vshll.u32 %v2198_v59, %v780_v52 }
  0x7b   : > { %2135 = vcosq.f32 %v646_v47  ;;  %vm2704_vm11 = vcmp.le.f32.partialorder %v662_v0, 0.7853982  ;;  %v785_v27 = vor.u32 %v784_v15, %v783_v39  ;;  %v788_v30 = vor.u32 %v787_v60, %v786_v58 }
  0x7c   : > { %2137 = vsinq.f32 %v646_v47  ;;  %v730_v24 = vclz %v2003_v41  ;;  %vm657_vm12 = vcmp.eq.s32.totalorder %v2666_v50, 2  ;;  %v791_v48 = vor.u32 %v790_v54, %v789_v6 }
  0x7d   : > { %v793_v23 = vshrl.u32 %v2199_v61, %v781_v28  ;;  %v795_v29 = vshll.u32 %v2199_v61, %v780_v52  ;;  %vm798_vm13 = vcmp.lt.s32.totalorder %v2680_v46, 1  ;;  %vm654_vm14 = vcmp.eq.s32.totalorder %v2666_v50, 0 }
  0x7e   : > { %v2004_v12 = vadd.s32 4294967294, %v730_v24  ;;  %v796_v0 = vshrl.u32 %v2200_v14, %v781_v28  ;;  %vm799_vm15 = vcmp.lt.s32.totalorder %v2680_v46, 2  ;;  %vm801_vm0 = vcmp.lt.s32.totalorder %v2680_v46, 4 }
  0x7f   : > { %vm653_vm1 = vcmp.lt.s32.totalorder %v2666_v50, 2  ;;  %v794_v34 = vor.u32 %v793_v23, %v792_v35  ;;  %vm800_vm2 = vcmp.lt.s32.totalorder %v2680_v46, 3  ;;  %v802_v31 = vsel %vm798_vm13, %v782_v42, %v785_v27 }
  0x80   : > { %v803_v49 = vsel %vm801_vm0, %v791_v48, 2102212464  ;;  %vm650_vm3 = vweird.f32 %v2332_v17  ;;  %vm2005_vm4 = vcmp.lt.s32.totalorder %v2004_v12, 0  ;;  %v797_v56 = vor.u32 %v796_v0, %v795_v29 }
  0x81   : > { %v804_v63 = vsel %vm800_vm2, %v788_v30, %v803_v49  ;;  %v806_v51 = vsel %vm798_vm13, %v785_v27, %v788_v30  ;;  %v733_v36 = vsel %vm2005_vm4, 0, %v2004_v12  ;;  %v807_v2 = vsel %vm801_vm0, %v794_v34, 920167782 }
  0x82   : > { %v810_v13 = vsel %vm798_vm13, %v788_v30, %v791_v48  ;;  %v880_v52 = vadd.s32 1, %v2010_v33  ;;  %v734_v43 = vsub.s32 32, %v733_v36  ;;  %v735_v45 = vshll.u32 %v2672_v40, %v733_v36 }
  0x83   : > { %v738_v28 = vsub.s32 4294967266, %v733_v36  ;;  %v808_v7 = vsel %vm800_vm2, %v791_v48, %v807_v2  ;;  %v805_v39 = vsel %vm799_vm15, %v802_v31, %v804_v63  ;;  %v811_v38 = vsel %vm801_vm0, %v797_v56, 1326507024 }
  0x84   : > { %v809_v58 = vsel %vm799_vm15, %v806_v51, %v808_v7  ;;  %vm881_vm5 = vcmp.gt.s32.totalorder %v880_v52, 0  ;;  %v736_v15 = vshrl.u32 %v718_v37, %v734_v43  ;;  %v812_v33 = vsel %vm800_vm2, %v794_v34, %v811_v38 }
  0x85   : > { %v739_v60 = vadd.s32 127, %v738_v28  ;;  %v882_v40 = vsel %vm881_vm5, %v880_v52, 0  ;;  %v2136_v6 = vpop.eup %2135  ;;  %v751_v47 = vsel %vm2704_vm11, 0, %v2698_v1  ;;  %v813_v41 = vsel %vm799_vm15, %v810_v13, %v812_v33 }
  0x86   : > { %v2748_v54 = vmul.u32.u64.low %v2674_v32, %v809_v58  ;;  %v2749_v42 = vmul.u32.u64.high %v2674_v32, %v809_v58, %v2748_v54  ;;  %v2138_v35 = vpop.eup %2137  ;;  %v658_v37 = vxor.u32 2147483648, %v2136_v6  ;;  %v737_v24 = vor.u32 %v736_v15, %v735_v45 }
  0x87   : > { %v740_v27 = vshll.u32 %v739_v60, 23  ;;  %v884_v30 = vand.u32 31, %v882_v40  ;;  %v655_v48 = vxor.u32 2147483648, %v2138_v35  ;;  %v821_v1 = vmul.u32 %v2674_v32, %v805_v39 }
  0x88   : > { %v2753_v23 = vmul.u32.u64.low %v2674_v32, %v813_v41  ;;  %v2754_v29 = vmul.u32.u64.high %v2674_v32, %v813_v41, %v2753_v23  ;;  %v659_v46 = vsel %vm657_vm12, %v658_v37, %v2138_v35  ;;  %v744_v0 = vcvt.s32.f32 %v737_v24 }
  0x89   : > { %v741_v12 = vor.u32 4788187, %v740_v27  ;;  %v885_v34 = vsub.s32 32, %v884_v30  ;;  %v656_v31 = vsel %vm654_vm14, %v2136_v6, %v655_v48  ;;  %v824_v49 = vadd.s32 1, %v2749_v42 }
  0x8a   : > { %v887_v56 = vshll.u32 %v2195_v53, %v884_v30  ;;  %v890_v63 = vshll.u32 %v2196_v55, %v884_v30  ;;  %v660_v51 = vsel %vm653_vm1, %v656_v31, %v659_v46  ;;  %v755_v36 = vadd.s32 3, %v751_v47 }
  0x8b   : > { %v742_v32 = vand.u32 2147483647, %v741_v12  ;;  %v888_v2 = vshrl.u32 %v2196_v55, %v885_v34  ;;  %v661_v13 = vsel %vm650_vm3, nan, %v660_v51  ;;  %vm823_vm6 = vc.u32 %v2754_v29, %v2748_v54 }
  0x8c   : > { %v883_v52 = vshrl.u32 %v882_v40, 5  ;;  %v891_v43 = vshrl.u32 %v2197_v57, %v885_v34  ;;  %v825_v28 = vsel %vm823_vm6, %v824_v49, %v2749_v42  ;;  %v893_v50 = vshll.u32 %v2197_v57, %v884_v30  ;;  %1912 = vst [vmem:[%s2636_s25 + $0x10] sm:$0xff] %v661_v13 }
  0x8d   : > { %v745_v45 = vmul.f32 %v744_v0, %v742_v32  ;;  %v889_v7 = vor.u32 %v888_v2, %v887_v56  ;;  %v826_v39 = vadd.s32 %v825_v28, %v821_v1  ;;  %v894_v38 = vshrl.u32 %v2198_v59, %v885_v34 }
  0x8e   : > { %v892_v58 = vor.u32 %v891_v43, %v890_v63  ;;  %v896_v17 = vshll.u32 %v2198_v59, %v884_v30  ;;  %v897_v60 = vshrl.u32 %v2199_v61, %v885_v34  ;;  %v899_v33 = vshll.u32 %v2199_v61, %v884_v30 }
  0x8f   : > { %v746_v15 = vxor.u32 2147483648, %v745_v45  ;;  %v900_v40 = vshrl.u32 %v2200_v14, %v885_v34  ;;  %v827_v6 = vadd.s32 536870912, %v826_v39  ;;  %v886_v47 = vshrl.u32 %v2195_v53, %v885_v34 }
  0x90   : > { %v895_v41 = vor.u32 %v894_v38, %v893_v50  ;;  %vm902_vm7 = vcmp.lt.s32.totalorder %v883_v52, 1  ;;  %v898_v35 = vor.u32 %v897_v60, %v896_v17  ;;  %vm905_vm8 = vcmp.lt.s32.totalorder %v883_v52, 4 }
  0x91   : > { %v747_v42 = vsel %vm664_vm10, %v746_v15, %v745_v45  ;;  %v901_v37 = vor.u32 %v900_v40, %v899_v33  ;;  %v828_v27 = vshrl.u32 %v827_v6, 30  ;;  %vm904_vm9 = vcmp.lt.s32.totalorder %v883_v52, 3 }
  0x92   : > { %v750_v24 = vsel %vm2704_vm11, %v2371_v44, %v747_v42  ;;  %v907_v30 = vsel %vm905_vm8, %v895_v41, 2102212464  ;;  %vm903_vm12 = vcmp.lt.s32.totalorder %v883_v52, 2  ;;  %v910_v48 = vsel %vm902_vm7, %v889_v7, %v892_v58 }
  0x93   : > { %2139 = vcosq.f32 %v750_v24  ;;  %v911_v23 = vsel %vm905_vm8, %v898_v35, 920167782  ;;  %v829_v1 = vshll.u32 %v828_v27, 30  ;;  %v906_v46 = vsel %vm902_vm7, %v886_v47, %v889_v7 }
  0x94   : > { %2141 = vsinq.f32 %v750_v24  ;;  %v908_v12 = vsel %vm904_vm9, %v892_v58, %v907_v30  ;;  %v912_v0 = vsel %vm904_vm9, %v895_v41, %v911_v23  ;;  %v914_v34 = vsel %vm902_vm7, %v892_v58, %v895_v41 }
  0x95   : > { %v915_v25 = vsel %vm905_vm8, %v901_v37, 1326507024  ;;  %v918_v31 = vshll.u32 %v878_v62, 8  ;;  %v830_v49 = vsub.s32 %v826_v39, %v829_v1  ;;  %v852_v56 = vsub.s32 4, %v828_v27 }
  0x96   : > { %v913_v63 = vsel %vm903_vm12, %v910_v48, %v912_v0  ;;  %v916_v51 = vsel %vm904_vm9, %v898_v35, %v915_v25  ;;  %v756_v32 = vand.u32 3, %v755_v36  ;;  %v909_v28 = vsel %vm903_vm12, %v906_v46, %v908_v12 }
  0x97   : > { %v917_v2 = vsel %vm903_vm12, %v914_v34, %v916_v51  ;;  %v2796_v13 = vmul.u32.u64.low %v918_v31, %v913_v63  ;;  %v2797_v43 = vmul.u32.u64.high %v918_v31, %v913_v63, %v2796_v13  ;;  %v832_v45 = vsub.s32 0, %v830_v49 }
  0x98   : > { %v2800_v7 = vmul.u32.u64.low %v918_v31, %v917_v2  ;;  %v2801_v50 = vmul.u32.u64.high %v918_v31, %v917_v2, %v2800_v7  ;;  %vm768_vm10 = vcmp.lt.s32.totalorder %v2334_v11, 0  ;;  %v977_v39 = vand.u32 2139095040, %v2338_v4 }
  0x99   : > { %v2007_v16 = vmin.u32 %v832_v45, %v830_v49  ;;  %v853_v62 = vsel %vm768_vm10, %v852_v56, %v828_v27  ;;  %vm754_vm11 = vweird.f32 %v2371_v44  ;;  %v925_v36 = vmul.u32 %v918_v31, %v909_v28 }
  0x9a   : > { %v928_v58 = vadd.s32 1, %v2797_v43  ;;  %vm757_vm13 = vcmp.lt.s32.totalorder %v756_v32, 2  ;;  %vm2811_vm14 = vcmp.le.f32.partialorder %v766_v26, 0.7853982  ;;  %v974_v17 = vand.u32 2147483647, %v2338_v4 }
  0x9b   : > { %v834_v38 = vclz %v2007_v16  ;;  %vm761_vm15 = vcmp.eq.s32.totalorder %v756_v32, 2  ;;  %v855_v60 = vsel %vm2811_vm14, 0, %v853_v62  ;;  %vm927_vm0 = vc.u32 %v2801_v50, %v2796_v13 }
  0x9c   : > { %v978_v33 = vshrl.u32 %v977_v39, 23  ;;  %vm758_vm1 = vcmp.eq.s32.totalorder %v756_v32, 0  ;;  %v929_v26 = vsel %vm927_vm0, %v928_v58, %v2797_v43  ;;  %v822_v42 = vadd.s32 %v2748_v54, %v2754_v29 }
  0x9d   : > { %v2140_v15 = vpop.eup %2139  ;;  %v2008_v47 = vadd.s32 4294967294, %v834_v38  ;;  %v930_v35 = vadd.s32 %v929_v26, %v925_v36  ;;  %v859_v27 = vadd.s32 3, %v855_v60  ;;  %v981_v30 = vand.u32 8388607, %v974_v17 }
  0x9e   : > { %v2142_v40 = vpop.eup %2141  ;;  %v762_v6 = vxor.u32 2147483648, %v2140_v15  ;;  %v2014_v37 = vadd.s32 4294967169, %v978_v33  ;;  %v1081_v31 = vand.u32 2139095040, %v2340_v5  ;;  %vm872_vm4 = vcmp.lt.s32.totalorder %v2336_v3, 0 }
  0x9f   : > { %v759_v41 = vxor.u32 2147483648, %v2142_v40  ;;  %vm2009_vm2 = vcmp.lt.s32.totalorder %v2008_v47, 0  ;;  %v931_v1 = vadd.s32 536870912, %v930_v35  ;;  %v982_v51 = vor.u32 8388608, %v981_v30 }
  0xa0   : > { %v763_v24 = vsel %vm761_vm15, %v762_v6, %v2142_v40  ;;  %v837_v23 = vsel %vm2009_vm2, 0, %v2008_v47  ;;  %v984_v46 = vadd.s32 1, %v2014_v37  ;;  %v926_v44 = vadd.s32 %v2796_v13, %v2801_v50 }
  0xa1   : > { %v760_v48 = vsel %vm758_vm1, %v2140_v15, %v759_v41  ;;  %v838_v0 = vsub.s32 32, %v837_v23  ;;  %v839_v34 = vshll.u32 %v830_v49, %v837_v23  ;;  %v842_v25 = vsub.s32 4294967266, %v837_v23 }
  0xa2   : > { %v764_v12 = vsel %vm757_vm13, %v760_v48, %v763_v24  ;;  %v932_v29 = vshrl.u32 %v931_v1, 30  ;;  %vm985_vm3 = vcmp.gt.s32.totalorder %v984_v46, 0  ;;  %v2830_v49 = vand.u32 3, %v859_v27 }
  0xa3   : > { %v765_v54 = vsel %vm754_vm11, nan, %v764_v12  ;;  %v840_v56 = vshrl.u32 %v822_v42, %v838_v0  ;;  %v843_v63 = vadd.s32 127, %v842_v25  ;;  %v986_v2 = vsel %vm985_vm3, %v984_v46, 0 }
  0xa4   : > { %1913 = vst [vmem:[%s2636_s25 + $0x18] sm:$0xff] %v765_v54  ;;  %v933_v43 = vshll.u32 %v932_v29, 30  ;;  %v988_v32 = vand.u32 31, %v986_v2  ;;  %v1078_v62 = vand.u32 2147483647, %v2340_v5  ;;  %v1082_v39 = vshrl.u32 %v1081_v31, 23 }
  0xa5   : > { %v841_v45 = vor.u32 %v840_v56, %v839_v34  ;;  %v844_v28 = vshll.u32 %v843_v63, 23  ;;  %v956_v38 = vsub.s32 4, %v932_v29  ;;  %v2836_v15 = vshll.u32 %v982_v51, 8 }
  0xa6   : > { %v2833_v7 = vsub.s32 %v930_v35, %v933_v43  ;;  %v989_v16 = vsub.s32 32, %v988_v32  ;;  %v991_v33 = vshll.u32 %v2195_v53, %v988_v32  ;;  %v994_v6 = vshll.u32 %v2196_v55, %v988_v32 }
  0xa7   : > { %v845_v36 = vor.u32 4788187, %v844_v28  ;;  %v848_v58 = vcvt.s32.f32 %v841_v45  ;;  %v997_v47 = vshll.u32 %v2197_v57, %v988_v32  ;;  %vm2847_vm5 = vcmp.le.f32.partialorder %v870_v22, 0.7853982 }
  0xa8   : > { %v936_v60 = vsub.s32 0, %v2833_v7  ;;  %v992_v40 = vshrl.u32 %v2196_v55, %v989_v16  ;;  %v995_v50 = vshrl.u32 %v2197_v57, %v989_v16  ;;  %v998_v26 = vshrl.u32 %v2198_v59, %v989_v16 }
  0xa9   : > { %v846_v13 = vand.u32 2147483647, %v845_v36  ;;  %v987_v35 = vshrl.u32 %v986_v2, 5  ;;  %v1000_v37 = vshll.u32 %v2198_v59, %v988_v32  ;;  %v2018_v24 = vadd.s32 4294967169, %v1082_v39 }
  0xaa   : > { %v2011_v42 = vmin.u32 %v936_v60, %v2833_v7  ;;  %v957_v30 = vsel %vm872_vm4, %v956_v38, %v932_v29  ;;  %v990_v48 = vshrl.u32 %v2195_v53, %v989_v16  ;;  %v1001_v23 = vshrl.u32 %v2199_v61, %v989_v16 }
  0xab   : > { %v849_v27 = vmul.f32 %v848_v58, %v846_v13  ;;  %v993_v46 = vor.u32 %v992_v40, %v991_v33  ;;  %v996_v22 = vor.u32 %v995_v50, %v994_v6  ;;  %v999_v12 = vor.u32 %v998_v26, %v997_v47 }
  0xac   : > { %v938_v1 = vclz %v2011_v42  ;;  %v1002_v34 = vor.u32 %v1001_v23, %v1000_v37  ;;  %v1003_v25 = vshll.u32 %v2199_v61, %v988_v32  ;;  %v1004_v54 = vshrl.u32 %v2200_v14, %v989_v16 }
  0xad   : > { %v850_v0 = vxor.u32 2147483648, %v849_v27  ;;  %vm1006_vm6 = vcmp.lt.s32.totalorder %v987_v35, 1  ;;  %vm1007_vm7 = vcmp.lt.s32.totalorder %v987_v35, 2  ;;  %vm1008_vm8 = vcmp.lt.s32.totalorder %v987_v35, 3 }
  0xae   : > { %v2012_v31 = vadd.s32 4294967294, %v938_v1  ;;  %v1005_v56 = vor.u32 %v1004_v54, %v1003_v25  ;;  %vm1009_vm9 = vcmp.lt.s32.totalorder %v987_v35, 4  ;;  %v1010_v63 = vsel %vm1006_vm6, %v990_v48, %v993_v46 }
  0xaf   : > { %v851_v29 = vsel %vm768_vm10, %v850_v0, %v849_v27  ;;  %v1011_v2 = vsel %vm1009_vm9, %v999_v12, 2102212464  ;;  %v1014_v43 = vsel %vm1006_vm6, %v993_v46, %v996_v22  ;;  %v1015_v28 = vsel %vm1009_vm9, %v1002_v34, 920167782 }
  0xb0   : > { %v854_v51 = vsel %vm2811_vm14, %v2334_v11, %v851_v29  ;;  %vm2013_vm12 = vcmp.lt.s32.totalorder %v2012_v31, 0  ;;  %v1012_v45 = vsel %vm1008_vm8, %v996_v22, %v1011_v2  ;;  %v959_v52 = vsel %vm2847_vm5, 0, %v957_v30 }
  0xb1   : > { %2143 = vcosq.f32 %v854_v51  ;;  %v941_v32 = vsel %vm2013_vm12, 0, %v2012_v31  ;;  %v1016_v58 = vsel %vm1008_vm8, %v999_v12, %v1015_v28  ;;  %v1018_v38 = vsel %vm1006_vm6, %v996_v22, %v999_v12 }
  0xb2   : > { %2145 = vsinq.f32 %v854_v51  ;;  %v942_v16 = vsub.s32 32, %v941_v32  ;;  %v943_v39 = vshll.u32 %v2833_v7, %v941_v32  ;;  %v946_v36 = vsub.s32 4294967266, %v941_v32 }
  0xb3   : > { %v1019_v60 = vsel %vm1009_vm9, %v1005_v56, 1326507024  ;;  %v1017_v6 = vsel %vm1007_vm7, %v1014_v43, %v1016_v58  ;;  %v1013_v50 = vsel %vm1007_vm7, %v1010_v63, %v1012_v45  ;;  %v1088_v48 = vadd.s32 1, %v2018_v24 }
  0xb4   : > { %v944_v33 = vshrl.u32 %v926_v44, %v942_v16  ;;  %v947_v40 = vadd.s32 127, %v946_v36  ;;  %v1020_v13 = vsel %vm1008_vm8, %v1002_v34, %v1019_v60  ;;  %v1085_v44 = vand.u32 8388607, %v1078_v62 }
  0xb5   : > { %v1021_v7 = vsel %vm1007_vm7, %v1018_v38, %v1020_v13  ;;  %v2880_v47 = vmul.u32.u64.low %v2836_v15, %v1017_v6  ;;  %v2881_v26 = vmul.u32.u64.high %v2836_v15, %v1017_v6, %v2880_v47  ;;  %v963_v46 = vadd.s32 3, %v959_v52 }
  0xb6   : > { %v945_v42 = vor.u32 %v944_v33, %v943_v39  ;;  %v948_v37 = vshll.u32 %v947_v40, 23  ;;  %v2885_v27 = vmul.u32.u64.low %v2836_v15, %v1021_v7  ;;  %v2886_v30 = vmul.u32.u64.high %v2836_v15, %v1021_v7, %v2885_v27 }
  0xb7   : > { %v1029_v35 = vmul.u32 %v2836_v15, %v1013_v50  ;;  %vm858_vm10 = vweird.f32 %v2334_v11  ;;  %vm861_vm11 = vcmp.lt.s32.totalorder %v2830_v49, 2  ;;  %v1032_v22 = vadd.s32 1, %v2881_v26 }
  0xb8   : > { %v949_v23 = vor.u32 4788187, %v948_v37  ;;  %v952_v1 = vcvt.s32.f32 %v945_v42  ;;  %vm1089_vm13 = vcmp.gt.s32.totalorder %v1088_v48, 0  ;;  %vm862_vm14 = vcmp.eq.s32.totalorder %v2830_v49, 0 }
  0xb9   : > { %vm1031_vm15 = vc.u32 %v2886_v30, %v2880_v47  ;;  %v1090_v0 = vsel %vm1089_vm13, %v1088_v48, 0  ;;  %vm865_vm0 = vcmp.eq.s32.totalorder %v2830_v49, 2  ;;  %v1086_v15 = vor.u32 8388608, %v1085_v44 }
  0xba   : > { %v950_v12 = vand.u32 2147483647, %v949_v23  ;;  %v1033_v34 = vsel %vm1031_vm15, %v1032_v22, %v2881_v26  ;;  %v1092_v25 = vand.u32 31, %v1090_v0  ;;  %v2899_v56 = vand.u32 3, %v963_v46 }
  0xbb   : > { %v2144_v24 = vpop.eup %2143  ;;  %v1034_v63 = vadd.s32 %v1033_v34, %v1029_v35  ;;  %v2901_v2 = vshrl.u32 %v1090_v0, 5  ;;  %v1185_v26 = vand.u32 2139095040, %v2342_v8  ;;  %vm976_vm2 = vcmp.lt.s32.totalorder %v2338_v4, 0 }
  0xbc   : > { %v2146_v54 = vpop.eup %2145  ;;  %v866_v31 = vxor.u32 2147483648, %v2144_v24  ;;  %v953_v29 = vmul.f32 %v952_v1, %v950_v12  ;;  %v1093_v43 = vsub.s32 32, %v1092_v25  ;;  %v1095_v32 = vshll.u32 %v2195_v53, %v1092_v25 }
  0xbd   : > { %v863_v51 = vxor.u32 2147483648, %v2146_v54  ;;  %v1035_v16 = vadd.s32 536870912, %v1034_v63  ;;  %v1098_v39 = vshll.u32 %v2196_v55, %v1092_v25  ;;  %v1101_v38 = vshll.u32 %v2197_v57, %v1092_v25 }
  0xbe   : > { %v867_v45 = vsel %vm865_vm0, %v866_v31, %v2146_v54  ;;  %v954_v28 = vxor.u32 2147483648, %v953_v29  ;;  %v1096_v52 = vshrl.u32 %v2196_v55, %v1093_v43  ;;  %v1099_v58 = vshrl.u32 %v2197_v57, %v1093_v43 }
  0xbf   : > { %v864_v36 = vsel %vm862_vm14, %v2144_v24, %v863_v51  ;;  %v1036_v40 = vshrl.u32 %v1035_v16, 30  ;;  %v1102_v6 = vshrl.u32 %v2198_v59, %v1093_v43  ;;  %v1094_v7 = vshrl.u32 %v2195_v53, %v1093_v43 }
  0xc0   : > { %v868_v60 = vsel %vm861_vm11, %v864_v36, %v867_v45  ;;  %v955_v33 = vsel %vm872_vm4, %v954_v28, %v953_v29  ;;  %v1097_v42 = vor.u32 %v1096_v52, %v1095_v32  ;;  %v1100_v37 = vor.u32 %v1099_v58, %v1098_v39 }
  0xc1   : > { %v869_v13 = vsel %vm858_vm10, nan, %v868_v60  ;;  %v958_v50 = vsel %vm2847_vm5, %v2336_v3, %v955_v33  ;;  %v1037_v49 = vshll.u32 %v1036_v40, 30  ;;  %v1104_v27 = vshll.u32 %v2198_v59, %v1092_v25 }
  0xc2   : > { %2147 = vcosq.f32 %v958_v50  ;;  %1914 = vst [vmem:[%s2636_s25 + $0x20] sm:$0xff] %v869_v13  ;;  %v1105_v44 = vshrl.u32 %v2199_v61, %v1093_v43  ;;  %v1107_v11 = vshll.u32 %v2199_v61, %v1092_v25  ;;  %v1103_v41 = vor.u32 %v1102_v6, %v1101_v38 }
  0xc3   : > { %2149 = vsinq.f32 %v958_v50  ;;  %v2926_v48 = vsub.s32 %v1034_v63, %v1037_v49  ;;  %v1108_v23 = vshrl.u32 %v2200_v14, %v1093_v43  ;;  %vm1110_vm1 = vcmp.lt.s32.totalorder %v2901_v2, 1 }
  0xc4   : > { %v1106_v1 = vor.u32 %v1105_v44, %v1104_v27  ;;  %vm1112_vm3 = vcmp.lt.s32.totalorder %v2901_v2, 3  ;;  %v1126_v46 = vshll.u32 %v1086_v15, 8  ;;  %vm965_vm4 = vcmp.lt.s32.totalorder %v2899_v56, 2 }
  0xc5   : > { %v1040_v35 = vsub.s32 0, %v2926_v48  ;;  %v1109_v22 = vor.u32 %v1108_v23, %v1107_v11  ;;  %vm1111_vm5 = vcmp.lt.s32.totalorder %v2901_v2, 2  ;;  %vm1113_vm6 = vcmp.lt.s32.totalorder %v2901_v2, 4 }
  0xc6   : > { %vm962_vm7 = vweird.f32 %v2336_v3  ;;  %v1115_v12 = vsel %vm1113_vm6, %v1103_v41, 2102212464  ;;  %v1118_v0 = vsel %vm1110_vm1, %v1097_v42, %v1100_v37  ;;  %v1119_v24 = vsel %vm1113_vm6, %v1106_v1, 920167782 }
  0xc7   : > { %v1182_v34 = vand.u32 2147483647, %v2342_v8  ;;  %vm2942_vm8 = vcmp.le.f32.partialorder %v974_v17, 0.7853982  ;;  %v2015_v25 = vmin.u32 %v1040_v35, %v2926_v48  ;;  %v1114_v54 = vsel %vm1110_vm1, %v1094_v7, %v1097_v42 }
  0xc8   : > { %v1120_v31 = vsel %vm1112_vm3, %v1103_v41, %v1119_v24  ;;  %v1186_v29 = vshrl.u32 %v1185_v26, 23  ;;  %v1116_v63 = vsel %vm1112_vm3, %v1100_v37, %v1115_v12  ;;  %v1122_v17 = vsel %vm1110_vm1, %v1100_v37, %v1103_v41 }
  0xc9   : > { %v1121_v51 = vsel %vm1111_vm5, %v1118_v0, %v1120_v31  ;;  %v1123_v43 = vsel %vm1113_vm6, %v1109_v22, 1326507024  ;;  %vm966_vm9 = vcmp.eq.s32.totalorder %v2899_v56, 0  ;;  %vm969_vm12 = vcmp.eq.s32.totalorder %v2899_v56, 2 }
  0xca   : > { %v1042_v32 = vclz %v2015_v25  ;;  %v1060_v45 = vsub.s32 4, %v1036_v40  ;;  %v1124_v28 = vsel %vm1112_vm3, %v1106_v1, %v1123_v43  ;;  %v1189_v36 = vand.u32 8388607, %v1182_v34 }
  0xcb   : > { %v2961_v16 = vmul.u32.u64.low %v1126_v46, %v1121_v51  ;;  %v2962_v39 = vmul.u32.u64.high %v1126_v46, %v1121_v51, %v2961_v16  ;;  %v1117_v38 = vsel %vm1111_vm5, %v1114_v54, %v1116_v63  ;;  %v1125_v60 = vsel %vm1111_vm5, %v1122_v17, %v1124_v28 }
  0xcc   : > { %v2148_v52 = vpop.eup %2147  ;;  %v2016_v58 = vadd.s32 4294967294, %v1042_v32  ;;  %v2022_v33 = vadd.s32 4294967169, %v1186_v29  ;;  %v1030_v50 = vadd.s32 %v2880_v47, %v2886_v30  ;;  %v1061_v42 = vsel %vm976_vm2, %v1060_v45, %v1036_v40 }
  0xcd   : > { %v2150_v6 = vpop.eup %2149  ;;  %v970_v13 = vxor.u32 2147483648, %v2148_v52  ;;  %v2973_v7 = vmul.u32.u64.low %v1126_v46, %v1125_v60  ;;  %v2974_v26 = vmul.u32.u64.high %v1126_v46, %v1125_v60, %v2973_v7  ;;  %v1133_v44 = vmul.u32 %v1126_v46, %v1117_v38 }
  0xce   : > { %v967_v49 = vxor.u32 2147483648, %v2150_v6  ;;  %vm2017_vm10 = vcmp.lt.s32.totalorder %v2016_v58, 0  ;;  %v1192_v37 = vadd.s32 1, %v2022_v33  ;;  %v1136_v11 = vadd.s32 1, %v2962_v39 }
  0xcf   : > { %v971_v27 = vsel %vm969_vm12, %v970_v13, %v2150_v6  ;;  %v1045_v2 = vsel %vm2017_vm10, 0, %v2016_v58  ;;  %v1063_v40 = vsel %vm2942_vm8, 0, %v1061_v42  ;;  %vm1135_vm11 = vc.u32 %v2974_v26, %v2961_v16 }
  0xd0   : > { %v968_v47 = vsel %vm966_vm9, %v2148_v52, %v967_v49  ;;  %v1046_v30 = vsub.s32 32, %v1045_v2  ;;  %v1047_v41 = vshll.u32 %v2926_v48, %v1045_v2  ;;  %v1050_v23 = vsub.s32 4294967266, %v1045_v2 }
  0xd1   : > { %v972_v1 = vsel %vm965_vm4, %v968_v47, %v971_v27  ;;  %vm1193_vm13 = vcmp.gt.s32.totalorder %v1192_v37, 0  ;;  %v1137_v12 = vsel %vm1135_vm11, %v1136_v11, %v2962_v39  ;;  %v1067_v54 = vadd.s32 3, %v1063_v40 }
  0xd2   : > { %v973_v46 = vsel %vm962_vm7, nan, %v972_v1  ;;  %v1048_v35 = vshrl.u32 %v1030_v50, %v1046_v30  ;;  %v1051_v22 = vadd.s32 127, %v1050_v23  ;;  %v1138_v0 = vadd.s32 %v1137_v12, %v1133_v44 }
  0xd3   : > { %v1194_v48 = vsel %vm1193_vm13, %v1192_v37, 0  ;;  %1915 = vst [vmem:[%s2636_s25 + $0x28] sm:$0xff] %v973_v46  ;;  %v1190_v29 = vor.u32 8388608, %v1189_v36  ;;  %v1289_v43 = vand.u32 2139095040, %v2344_v9  ;;  %v3003_v50 = vand.u32 3, %v1067_v54 }
  0xd4   : > { %v1049_v24 = vor.u32 %v1048_v35, %v1047_v41  ;;  %v1052_v56 = vshll.u32 %v1051_v22, 23  ;;  %v1196_v25 = vand.u32 31, %v1194_v48  ;;  %v1139_v31 = vadd.s32 536870912, %v1138_v0 }
  0xd5   : > { %v1195_v32 = vshrl.u32 %v1194_v48, 5  ;;  %v3008_v37 = vshll.u32 %v1190_v29, 8  ;;  %vm1080_vm14 = vcmp.lt.s32.totalorder %v2340_v5, 0  ;;  %v1290_v41 = vshrl.u32 %v1289_v43, 23 }
  0xd6   : > { %v1053_v63 = vor.u32 4788187, %v1052_v56  ;;  %v1056_v51 = vcvt.s32.f32 %v1049_v24  ;;  %v1197_v17 = vsub.s32 32, %v1196_v25  ;;  %v1140_v3 = vshrl.u32 %v1139_v31, 30 }
  0xd7   : > { %v1199_v45 = vshll.u32 %v2195_v53, %v1196_v25  ;;  %v1202_v28 = vshll.u32 %v2196_v55, %v1196_v25  ;;  %v1208_v38 = vshll.u32 %v2198_v59, %v1196_v25  ;;  %v1205_v36 = vshll.u32 %v2197_v57, %v1196_v25 }
  0xd8   : > { %v1054_v39 = vand.u32 2147483647, %v1053_v63  ;;  %v1200_v52 = vshrl.u32 %v2196_v55, %v1197_v17  ;;  %v1203_v58 = vshrl.u32 %v2197_v57, %v1197_v17  ;;  %v1141_v60 = vshll.u32 %v1140_v3, 30 }
  0xd9   : > { %v1206_v33 = vshrl.u32 %v2198_v59, %v1197_v17  ;;  %v1209_v6 = vshrl.u32 %v2199_v61, %v1197_v17  ;;  %v1211_v42 = vshll.u32 %v2199_v61, %v1196_v25  ;;  %v1212_v11 = vshrl.u32 %v2200_v14, %v1197_v17 }
  0xda   : > { %v1057_v13 = vmul.f32 %v1056_v51, %v1054_v39  ;;  %v3005_v7 = vsub.s32 %v1138_v0, %v1141_v60  ;;  %v1201_v49 = vor.u32 %v1200_v52, %v1199_v45  ;;  %v1204_v2 = vor.u32 %v1203_v58, %v1202_v28 }
  0xdb   : > { %v1210_v44 = vor.u32 %v1209_v6, %v1208_v38  ;;  %v1207_v30 = vor.u32 %v1206_v33, %v1205_v36  ;;  %vm1214_vm15 = vcmp.lt.s32.totalorder %v1195_v32, 1  ;;  %v1198_v1 = vshrl.u32 %v2195_v53, %v1197_v17 }
  0xdc   : > { %v1058_v27 = vxor.u32 2147483648, %v1057_v13  ;;  %v1144_v47 = vsub.s32 0, %v3005_v7  ;;  %vm1216_vm0 = vcmp.lt.s32.totalorder %v1195_v32, 3  ;;  %vm1217_vm1 = vcmp.lt.s32.totalorder %v1195_v32, 4 }
  0xdd   : > { %v1213_v35 = vor.u32 %v1212_v11, %v1211_v42  ;;  %v1219_v22 = vsel %vm1217_vm1, %v1207_v30, 2102212464  ;;  %vm3023_vm3 = vcmp.le.f32.partialorder %v1078_v62, 0.7853982  ;;  %v1222_v0 = vsel %vm1214_vm15, %v1201_v49, %v1204_v2 }
  0xde   : > { %v1059_v23 = vsel %vm976_vm2, %v1058_v27, %v1057_v13  ;;  %v2019_v46 = vmin.u32 %v1144_v47, %v3005_v7  ;;  %vm1215_vm2 = vcmp.lt.s32.totalorder %v1195_v32, 2  ;;  %v1223_v48 = vsel %vm1217_vm1, %v1210_v44, 920167782 }
  0xdf   : > { %v1062_v40 = vsel %vm2942_vm8, %v2338_v4, %v1059_v23  ;;  %v1164_v24 = vsub.s32 4, %v1140_v3  ;;  %v1286_v56 = vand.u32 2147483647, %v2344_v9  ;;  %v1218_v25 = vsel %vm1214_vm15, %v1198_v1, %v1201_v49 }
  0xe0   : > { %2151 = vcosq.f32 %v1062_v40  ;;  %v1146_v15 = vclz %v2019_v46  ;;  %v1220_v54 = vsel %vm1216_vm0, %v1204_v2, %v1219_v22  ;;  %v1224_v31 = vsel %vm1216_vm0, %v1207_v30, %v1223_v48 }
  0xe1   : > { %2153 = vsinq.f32 %v1062_v40  ;;  %v1226_v62 = vsel %vm1214_vm15, %v1204_v2, %v1207_v30  ;;  %v1134_v29 = vadd.s32 %v2961_v16, %v2974_v26  ;;  %v1225_v51 = vsel %vm1215_vm2, %v1222_v0, %v1224_v31 }
  0xe2   : > { %v2020_v63 = vadd.s32 4294967294, %v1146_v15  ;;  %v1227_v17 = vsel %vm1217_vm1, %v1213_v35, 1326507024  ;;  %v3040_v45 = vmul.u32.u64.low %v3008_v37, %v1225_v51  ;;  %v3041_v28 = vmul.u32.u64.high %v3008_v37, %v1225_v51, %v3040_v45 }
  0xe3   : > { %v1228_v43 = vsel %vm1216_vm0, %v1210_v44, %v1227_v17  ;;  %v2026_v39 = vadd.s32 4294967169, %v1290_v41  ;;  %vm1066_vm4 = vweird.f32 %v2338_v4  ;;  %v1165_v52 = vsel %vm1080_vm14, %v1164_v24, %v1140_v3 }
  0xe4   : > { %vm2021_vm5 = vcmp.lt.s32.totalorder %v2020_v63, 0  ;;  %v1221_v16 = vsel %vm1215_vm2, %v1218_v25, %v1220_v54  ;;  %v1229_v26 = vsel %vm1215_vm2, %v1226_v62, %v1228_v43  ;;  %vm1069_vm6 = vcmp.lt.s32.totalorder %v3003_v50, 2 }
  0xe5   : > { %v1149_v58 = vsel %vm2021_vm5, 0, %v2020_v63  ;;  %v3050_v38 = vmul.u32.u64.low %v3008_v37, %v1229_v26  ;;  %v3051_v60 = vmul.u32.u64.high %v3008_v37, %v1229_v26, %v3050_v38  ;;  %v1296_v36 = vadd.s32 1, %v2026_v39 }
  0xe6   : > { %v1150_v33 = vsub.s32 32, %v1149_v58  ;;  %v1151_v6 = vshll.u32 %v3005_v7, %v1149_v58  ;;  %v1154_v13 = vsub.s32 4294967266, %v1149_v58  ;;  %v1237_v49 = vmul.u32 %v3008_v37, %v1221_v16 }
  0xe7   : > { %v1240_v3 = vadd.s32 1, %v3041_v28  ;;  %v1293_v32 = vand.u32 8388607, %v1286_v56  ;;  %vm1297_vm7 = vcmp.gt.s32.totalorder %v1296_v36, 0  ;;  %v1167_v2 = vsel %vm3023_vm3, 0, %v1165_v52 }
  0xe8   : > { %v1152_v42 = vshrl.u32 %v1134_v29, %v1150_v33  ;;  %v1155_v27 = vadd.s32 127, %v1154_v13  ;;  %v1298_v44 = vsel %vm1297_vm7, %v1296_v36, 0  ;;  %vm1070_vm8 = vcmp.eq.s32.totalorder %v3003_v50, 0 }
  0xe9   : > { %vm1073_vm9 = vcmp.eq.s32.totalorder %v3003_v50, 2  ;;  %vm1239_vm12 = vc.u32 %v3051_v60, %v3040_v45  ;;  %v1300_v7 = vand.u32 31, %v1298_v44  ;;  %v1171_v40 = vadd.s32 3, %v1167_v2 }
  0xea   : > { %v2152_v11 = vpop.eup %2151  ;;  %v1153_v30 = vor.u32 %v1152_v42, %v1151_v6  ;;  %v1156_v41 = vshll.u32 %v1155_v27, 23  ;;  %v1241_v23 = vsel %vm1239_vm12, %v1240_v3, %v3041_v28  ;;  %v1294_v15 = vor.u32 8388608, %v1293_v32 }
  0xeb   : > { %v2154_v37 = vpop.eup %2153  ;;  %v1074_v47 = vxor.u32 2147483648, %v2152_v11  ;;  %v1242_v46 = vadd.s32 %v1241_v23, %v1237_v49  ;;  %v1301_v35 = vsub.s32 32, %v1300_v7  ;;  %v1303_v54 = vshll.u32 %v2195_v53, %v1300_v7 }
  0xec   : > { %v1071_v1 = vxor.u32 2147483648, %v2154_v37  ;;  %v1157_v0 = vor.u32 4788187, %v1156_v41  ;;  %v1160_v48 = vcvt.s32.f32 %v1153_v30  ;;  %v1306_v31 = vshll.u32 %v2196_v55, %v1300_v7 }
  0xed   : > { %v1075_v22 = vsel %vm1073_vm9, %v1074_v47, %v2154_v37  ;;  %v1243_v25 = vadd.s32 536870912, %v1242_v46  ;;  %v1304_v63 = vshrl.u32 %v2196_v55, %v1301_v35  ;;  %v1307_v51 = vshrl.u32 %v2197_v57, %v1301_v35 }
  0xee   : > { %v1072_v24 = vsel %vm1070_vm8, %v2152_v11, %v1071_v1  ;;  %v1158_v29 = vand.u32 2147483647, %v1157_v0  ;;  %v1309_v28 = vshll.u32 %v2197_v57, %v1300_v7  ;;  %v1310_v39 = vshrl.u32 %v2198_v59, %v1301_v35 }
  0xef   : > { %v1076_v62 = vsel %vm1069_vm6, %v1072_v24, %v1075_v22  ;;  %v3076_v43 = vshrl.u32 %v1243_v25, 30  ;;  %v1299_v16 = vshrl.u32 %v1298_v44, 5  ;;  %v1312_v26 = vshll.u32 %v2198_v59, %v1300_v7 }
  0xf0   : > { %v1077_v17 = vsel %vm1066_vm4, nan, %v1076_v62  ;;  %v1161_v52 = vmul.f32 %v1160_v48, %v1158_v29  ;;  %v1313_v50 = vshrl.u32 %v2199_v61, %v1301_v35  ;;  %v1315_v38 = vshll.u32 %v2199_v61, %v1300_v7 }
  0xf1   : > { %1916 = vst [vmem:[%s2636_s25 + $0x30] sm:$0xff] %v1077_v17  ;;  %v1245_v58 = vshll.u32 %v3076_v43, 30  ;;  %v3085_v36 = vshll.u32 %v1294_v15, 8  ;;  %v1393_v4 = vand.u32 2139095040, %v2346_v10  ;;  %v1302_v6 = vshrl.u32 %v2195_v53, %v1301_v35 }
  0xf2   : > { %v1162_v33 = vxor.u32 2147483648, %v1161_v52  ;;  %v1314_v13 = vor.u32 %v1313_v50, %v1312_v26  ;;  %v1316_v49 = vshrl.u32 %v2200_v14, %v1301_v35  ;;  %v1305_v32 = vor.u32 %v1304_v63, %v1303_v54 }
  0xf3   : > { %v3090_v3 = vsub.s32 %v1242_v46, %v1245_v58  ;;  %v1308_v42 = vor.u32 %v1307_v51, %v1306_v31  ;;  %v1311_v27 = vor.u32 %v1310_v39, %v1309_v28  ;;  %vm1318_vm10 = vcmp.lt.s32.totalorder %v1299_v16, 1 }
  0xf4   : > { %v1163_v2 = vsel %vm1080_vm14, %v1162_v33, %v1161_v52  ;;  %v1317_v44 = vor.u32 %v1316_v49, %v1315_v38  ;;  %vm1321_vm11 = vcmp.lt.s32.totalorder %v1299_v16, 4  ;;  %vm1319_vm13 = vcmp.lt.s32.totalorder %v1299_v16, 2 }
  0xf5   : > { %v1166_v11 = vsel %vm3023_vm3, %v2340_v5, %v1163_v2  ;;  %v1248_v7 = vsub.s32 0, %v3090_v3  ;;  %vm1320_vm15 = vcmp.lt.s32.totalorder %v1299_v16, 3  ;;  %v1322_v37 = vsel %vm1318_vm10, %v1302_v6, %v1305_v32 }
  0xf6   : > { %2155 = vcosq.f32 %v1166_v11  ;;  %v1323_v47 = vsel %vm1321_vm11, %v1311_v27, 2102212464  ;;  %v1327_v30 = vsel %vm1321_vm11, %v1314_v13, 920167782  ;;  %v1326_v1 = vsel %vm1318_vm10, %v1305_v32, %v1308_v42 }
  0xf7   : > { %2157 = vsinq.f32 %v1166_v11  ;;  %v2023_v41 = vmin.u32 %v1248_v7, %v3090_v3  ;;  %v1324_v23 = vsel %vm1320_vm15, %v1308_v42, %v1323_v47  ;;  %v1328_v46 = vsel %vm1320_vm15, %v1311_v27, %v1327_v30 }
  0xf8   : > { %v1330_v35 = vsel %vm1318_vm10, %v1308_v42, %v1311_v27  ;;  %v1331_v22 = vsel %vm1321_vm11, %v1317_v44, 1326507024  ;;  %v1172_v12 = vand.u32 3, %v1171_v40  ;;  %v1390_v48 = vand.u32 2147483647, %v2346_v10 }
  0xf9   : > { %v1250_v0 = vclz %v2023_v41  ;;  %v1325_v15 = vsel %vm1319_vm13, %v1322_v37, %v1324_v23  ;;  %v1329_v24 = vsel %vm1319_vm13, %v1326_v1, %v1328_v46  ;;  %v1332_v25 = vsel %vm1320_vm15, %v1314_v13, %v1331_v22 }
  0xfa   : > { %v1394_v54 = vshrl.u32 %v1393_v4, 23  ;;  %vm1170_vm14 = vweird.f32 %v2340_v5  ;;  %v1333_v62 = vsel %vm1319_vm13, %v1330_v35, %v1332_v25  ;;  %v1268_v40 = vsub.s32 4, %v3076_v43 }
  0xfb   : > { %v2024_v31 = vadd.s32 4294967294, %v1250_v0  ;;  %v3108_v29 = vmul.u32.u64.low %v3085_v36, %v1329_v24  ;;  %v3109_v63 = vmul.u32.u64.high %v3085_v36, %v1329_v24, %v3108_v29  ;;  %vm1174_vm0 = vcmp.eq.s32.totalorder %v1172_v12, 0 }
  0xfc   : > { %v3114_v51 = vmul.u32.u64.low %v3085_v36, %v1333_v62  ;;  %v3115_v17 = vmul.u32.u64.high %v3085_v36, %v1333_v62, %v3114_v51  ;;  %v2030_v28 = vadd.s32 4294967169, %v1394_v54  ;;  %vm1184_vm1 = vcmp.lt.s32.totalorder %v2342_v8, 0 }
  0xfd   : > { %v1238_v39 = vadd.s32 %v3040_v45, %v3051_v60  ;;  %vm2025_vm3 = vcmp.lt.s32.totalorder %v2024_v31, 0  ;;  %vm1177_vm2 = vcmp.eq.s32.totalorder %v1172_v12, 2  ;;  %v1341_v16 = vmul.u32 %v3085_v36, %v1325_v15 }
  0xfe   : > { %v1253_v52 = vsel %vm2025_vm3, 0, %v2024_v31  ;;  %v1400_v26 = vadd.s32 1, %v2030_v28  ;;  %v1344_v4 = vadd.s32 1, %v3109_v63  ;;  %v1269_v6 = vsel %vm1184_vm1, %v1268_v40, %v3076_v43 }
  0xff   : > { %v1254_v50 = vsub.s32 32, %v1253_v52  ;;  %v1255_v58 = vshll.u32 %v3090_v3, %v1253_v52  ;;  %v1258_v38 = vsub.s32 4294967266, %v1253_v52  ;;  %vm1343_vm4 = vc.u32 %v3115_v17, %v3108_v29 }
 0x100   : > { %v2156_v33 = vpop.eup %2155  ;;  %v1397_v45 = vand.u32 8388607, %v1390_v48  ;;  %vm1401_vm5 = vcmp.gt.s32.totalorder %v1400_v26, 0  ;;  %v1345_v3 = vsel %vm1343_vm4, %v1344_v4, %v3109_v63  ;;  %vm1173_vm6 = vcmp.lt.s32.totalorder %v1172_v12, 2 }
 0x101   : > { %v2158_v60 = vpop.eup %2157  ;;  %v1178_v36 = vxor.u32 2147483648, %v2156_v33  ;;  %v1256_v13 = vshrl.u32 %v1238_v39, %v1254_v50  ;;  %v1259_v49 = vadd.s32 127, %v1258_v38  ;;  %v1346_v42 = vadd.s32 %v1345_v3, %v1341_v16 }
 0x102   : > { %v1175_v32 = vxor.u32 2147483648, %v2158_v60  ;;  %v1402_v27 = vsel %vm1401_vm5, %v1400_v26, 0  ;;  %vm3134_vm7 = vcmp.le.f32.partialorder %v1182_v34, 0.7853982  ;;  %v1398_v46 = vor.u32 8388608, %v1397_v45 }
 0x103   : > { %v1179_v2 = vsel %vm1177_vm2, %v1178_v36, %v2158_v60  ;;  %v1257_v44 = vor.u32 %v1256_v13, %v1255_v58  ;;  %v1260_v11 = vshll.u32 %v1259_v49, 23  ;;  %v1271_v37 = vsel %vm3134_vm7, 0, %v1269_v6 }
 0x104   : > { %v1176_v7 = vsel %vm1174_vm0, %v2156_v33, %v1175_v32  ;;  %v1347_v47 = vadd.s32 536870912, %v1346_v42  ;;  %v1404_v30 = vand.u32 31, %v1402_v27  ;;  %v1497_v0 = vand.u32 2139095040, %v2348_v18 }
 0x105   : > { %v1180_v41 = vsel %vm1173_vm6, %v1176_v7, %v1179_v2  ;;  %v1261_v23 = vor.u32 4788187, %v1260_v11  ;;  %v1264_v1 = vcvt.s32.f32 %v1257_v44  ;;  %v1403_v15 = vshrl.u32 %v1402_v27, 5 }
 0x106   : > { %v1181_v34 = vsel %vm1170_vm14, nan, %v1180_v41  ;;  %v3143_v35 = vshrl.u32 %v1347_v47, 30  ;;  %v1405_v22 = vsub.s32 32, %v1404_v30  ;;  %v1407_v24 = vshll.u32 %v2195_v53, %v1404_v30 }
 0x107   : > { %v1262_v12 = vand.u32 2147483647, %v1261_v23  ;;  %v1410_v25 = vshll.u32 %v2196_v55, %v1404_v30  ;;  %1917 = vst [vmem:[%s2636_s25 + $0x38] sm:$0xff] %v1181_v34  ;;  %v1413_v62 = vshll.u32 %v2197_v57, %v1404_v30  ;;  %v1416_v5 = vshll.u32 %v2198_v59, %v1404_v30 }
 0x108   : > { %v1349_v54 = vshll.u32 %v3143_v35, 30  ;;  %v1408_v31 = vshrl.u32 %v2196_v55, %v1405_v22  ;;  %v1411_v40 = vshrl.u32 %v2197_v57, %v1405_v22  ;;  %v1414_v51 = vshrl.u32 %v2198_v59, %v1405_v22 }
 0x109   : > { %v1265_v63 = vmul.f32 %v1264_v1, %v1262_v12  ;;  %v1417_v28 = vshrl.u32 %v2199_v61, %v1405_v22  ;;  %v1275_v39 = vadd.s32 3, %v1271_v37  ;;  %v1419_v16 = vshll.u32 %v2199_v61, %v1404_v30 }
 0x10a   : > { %v3156_v52 = vsub.s32 %v1346_v42, %v1349_v54  ;;  %v1406_v50 = vshrl.u32 %v2195_v53, %v1405_v22  ;;  %v3160_v58 = vshll.u32 %v1398_v46, 8  ;;  %v1498_v38 = vshrl.u32 %v1497_v0, 23 }
 0x10b   : > { %v1266_v26 = vxor.u32 2147483648, %v1265_v63  ;;  %v1409_v33 = vor.u32 %v1408_v31, %v1407_v24  ;;  %v1412_v6 = vor.u32 %v1411_v40, %v1410_v25  ;;  %v1420_v45 = vshrl.u32 %v2200_v14, %v1405_v22 }
 0x10c   : > { %v1352_v4 = vsub.s32 0, %v3156_v52  ;;  %v1415_v36 = vor.u32 %v1414_v51, %v1413_v62  ;;  %v1418_v13 = vor.u32 %v1417_v28, %v1416_v5  ;;  %vm1422_vm8 = vcmp.lt.s32.totalorder %v1403_v15, 1 }
 0x10d   : > { %v1267_v60 = vsel %vm1184_vm1, %v1266_v26, %v1265_v63  ;;  %v1421_v32 = vor.u32 %v1420_v45, %v1419_v16  ;;  %vm1425_vm9 = vcmp.lt.s32.totalorder %v1403_v15, 4  ;;  %vm1423_vm12 = vcmp.lt.s32.totalorder %v1403_v15, 2 }
 0x10e   : > { %v1270_v49 = vsel %vm3134_vm7, %v2342_v8, %v1267_v60  ;;  %v2027_v3 = vmin.u32 %v1352_v4, %v3156_v52  ;;  %vm1424_vm10 = vcmp.lt.s32.totalorder %v1403_v15, 3  ;;  %v1427_v42 = vsel %vm1425_vm9, %v1415_v36, 2102212464 }
 0x10f   : > { %2159 = vcosq.f32 %v1270_v49  ;;  %v1426_v2 = vsel %vm1422_vm8, %v1406_v50, %v1409_v33  ;;  %v1430_v44 = vsel %vm1422_vm8, %v1409_v33, %v1412_v6  ;;  %v1276_v11 = vand.u32 3, %v1275_v39 }
 0x110   : > { %2161 = vsinq.f32 %v1270_v49  ;;  %v1354_v27 = vclz %v2027_v3  ;;  %v1428_v7 = vsel %vm1424_vm10, %v1412_v6, %v1427_v42  ;;  %v1431_v43 = vsel %vm1425_vm9, %v1418_v13, 920167782 }
 0x111   : > { %v1434_v37 = vsel %vm1422_vm8, %v1412_v6, %v1415_v36  ;;  %v1342_v47 = vadd.s32 %v3108_v29, %v3115_v17  ;;  %v1432_v41 = vsel %vm1424_vm10, %v1415_v36, %v1431_v43  ;;  %v1435_v23 = vsel %vm1425_vm9, %v1421_v32, 1326507024 }
 0x112   : > { %v2028_v30 = vadd.s32 4294967294, %v1354_v27  ;;  %v1429_v1 = vsel %vm1423_vm12, %v1426_v2, %v1428_v7  ;;  %v1433_v46 = vsel %vm1423_vm12, %v1430_v44, %v1432_v41  ;;  %v1436_v34 = vsel %vm1424_vm10, %v1418_v13, %v1435_v23 }
 0x113   : > { %v2034_v22 = vadd.s32 4294967169, %v1498_v38  ;;  %vm1274_vm11 = vweird.f32 %v2342_v8  ;;  %v1437_v0 = vsel %vm1423_vm12, %v1434_v37, %v1436_v34  ;;  %v1372_v24 = vsub.s32 4, %v3143_v35 }
 0x114   : > { %vm2029_vm13 = vcmp.lt.s32.totalorder %v2028_v30, 0  ;;  %v3186_v12 = vmul.u32.u64.low %v3160_v58, %v1433_v46  ;;  %v3187_v29 = vmul.u32.u64.high %v3160_v58, %v1433_v46, %v3186_v12  ;;  %vm1278_vm15 = vcmp.eq.s32.totalorder %v1276_v11, 0 }
 0x115   : > { %v1357_v17 = vsel %vm2029_vm13, 0, %v2028_v30  ;;  %v3192_v25 = vmul.u32.u64.low %v3160_v58, %v1437_v0  ;;  %v3193_v54 = vmul.u32.u64.high %v3160_v58, %v1437_v0, %v3192_v25  ;;  %v1504_v63 = vadd.s32 1, %v2034_v22 }
 0x116   : > { %v1358_v31 = vsub.s32 32, %v1357_v17  ;;  %v1359_v62 = vshll.u32 %v3156_v52, %v1357_v17  ;;  %v1362_v5 = vsub.s32 4294967266, %v1357_v17  ;;  %vm1281_vm14 = vcmp.eq.s32.totalorder %v1276_v11, 2 }
 0x117   : > { %vm1288_vm0 = vcmp.lt.s32.totalorder %v2344_v9, 0  ;;  %v1445_v15 = vmul.u32 %v3160_v58, %v1429_v1  ;;  %v1448_v28 = vadd.s32 1, %v3187_v29  ;;  %vm1505_vm1 = vcmp.gt.s32.totalorder %v1504_v63, 0 }
 0x118   : > { %v1360_v40 = vshrl.u32 %v1342_v47, %v1358_v31  ;;  %v1363_v51 = vadd.s32 127, %v1362_v5  ;;  %v1373_v16 = vsel %vm1288_vm0, %v1372_v24, %v3143_v35  ;;  %vm1447_vm3 = vc.u32 %v3193_v54, %v3186_v12 }
 0x119   : > { %v2160_v39 = vpop.eup %2159  ;;  %v1494_v52 = vand.u32 2147483647, %v2348_v18  ;;  %v1506_v26 = vsel %vm1505_vm1, %v1504_v63, 0  ;;  %v1449_v33 = vsel %vm1447_vm3, %v1448_v28, %v3187_v29  ;;  %vm1277_vm2 = vcmp.lt.s32.totalorder %v1276_v11, 2 }
 0x11a   : > { %v2162_v50 = vpop.eup %2161  ;;  %v1282_v38 = vxor.u32 2147483648, %v2160_v39  ;;  %v1361_v4 = vor.u32 %v1360_v40, %v1359_v62  ;;  %v1364_v58 = vshll.u32 %v1363_v51, 23  ;;  %v1450_v45 = vadd.s32 %v1449_v33, %v1445_v15 }
 0x11b   : > { %v1279_v6 = vxor.u32 2147483648, %v2162_v50  ;;  %v1508_v60 = vand.u32 31, %v1506_v26  ;;  %vm3209_vm4 = vcmp.le.f32.partialorder %v1286_v56, 0.7853982  ;;  %v1501_v7 = vand.u32 8388607, %v1494_v52 }
 0x11c   : > { %v1283_v36 = vsel %vm1281_vm14, %v1282_v38, %v2162_v50  ;;  %v1365_v13 = vor.u32 4788187, %v1364_v58  ;;  %v1368_v49 = vcvt.s32.f32 %v1361_v4  ;;  %v1375_v32 = vsel %vm3209_vm4, 0, %v1373_v16 }
 0x11d   : > { %v1280_v3 = vsel %vm1278_vm15, %v2160_v39, %v1279_v6  ;;  %v1451_v42 = vadd.s32 536870912, %v1450_v45  ;;  %v1509_v27 = vsub.s32 32, %v1508_v60  ;;  %v1507_v43 = vshrl.u32 %v1506_v26, 5 }
 0x11e   : > { %v1284_v2 = vsel %vm1277_vm2, %v1280_v3, %v1283_v36  ;;  %v1366_v44 = vand.u32 2147483647, %v1365_v13  ;;  %v1511_v11 = vshll.u32 %v2195_v53, %v1508_v60  ;;  %v1514_v47 = vshll.u32 %v2196_v55, %v1508_v60 }
 0x11f   : > { %v1285_v56 = vsel %vm1274_vm11, nan, %v1284_v2  ;;  %v3220_v37 = vshrl.u32 %v1451_v42, 30  ;;  %v1512_v41 = vshrl.u32 %v2196_v55, %v1509_v27  ;;  %v1515_v23 = vshrl.u32 %v2197_v57, %v1509_v27 }
 0x120   : > { %v1369_v30 = vmul.f32 %v1368_v49, %v1366_v44  ;;  %v1520_v1 = vshll.u32 %v2198_v59, %v1508_v60  ;;  %1918 = vst [vmem:[%s2636_s25 + $0x40] sm:$0xff] %v1285_v56  ;;  %v1517_v34 = vshll.u32 %v2197_v57, %v1508_v60  ;;  %v1518_v8 = vshrl.u32 %v2198_v59, %v1509_v27 }
 0x121   : > { %v1453_v46 = vshll.u32 %v3220_v37, 30  ;;  %v1521_v22 = vshrl.u32 %v2199_v61, %v1509_v27  ;;  %v1379_v29 = vadd.s32 3, %v1375_v32  ;;  %v1523_v17 = vshll.u32 %v2199_v61, %v1508_v60 }
 0x122   : > { %v1370_v0 = vxor.u32 2147483648, %v1369_v30  ;;  %v1502_v25 = vor.u32 8388608, %v1501_v7  ;;  %v1510_v31 = vshrl.u32 %v2195_v53, %v1509_v27  ;;  %v1524_v62 = vshrl.u32 %v2200_v14, %v1509_v27 }
 0x123   : > { %v3233_v24 = vsub.s32 %v1450_v45, %v1453_v46  ;;  %v1513_v63 = vor.u32 %v1512_v41, %v1511_v11  ;;  %v1516_v15 = vor.u32 %v1515_v23, %v1514_v47  ;;  %v1522_v40 = vor.u32 %v1521_v22, %v1520_v1 }
 0x124   : > { %v1371_v5 = vsel %vm1288_vm0, %v1370_v0, %v1369_v30  ;;  %v1519_v39 = vor.u32 %v1518_v8, %v1517_v34  ;;  %vm1526_vm5 = vcmp.lt.s32.totalorder %v1507_v43, 1  ;;  %v3243_v16 = vand.u32 3, %v1379_v29 }
 0x125   : > { %v1374_v51 = vsel %vm3209_vm4, %v2344_v9, %v1371_v5  ;;  %v1456_v28 = vsub.s32 0, %v3233_v24  ;;  %v1525_v26 = vor.u32 %v1524_v62, %v1523_v17  ;;  %vm1529_vm6 = vcmp.lt.s32.totalorder %v1507_v43, 4 }
 0x126   : > { %2163 = vcosq.f32 %v1374_v51  ;;  %vm1528_vm7 = vcmp.lt.s32.totalorder %v1507_v43, 3  ;;  %v1531_v38 = vsel %vm1529_vm6, %v1519_v39, 2102212464  ;;  %vm1527_vm8 = vcmp.lt.s32.totalorder %v1507_v43, 2 }
 0x127   : > { %2165 = vsinq.f32 %v1374_v51  ;;  %v2031_v50 = vmin.u32 %v1456_v28, %v3233_v24  ;;  %v1534_v4 = vsel %vm1526_vm5, %v1513_v63, %v1516_v15  ;;  %v1535_v58 = vsel %vm1529_vm6, %v1522_v40, 920167782 }
 0x128   : > { %v1542_v33 = vshll.u32 %v1502_v25, 8  ;;  %v1446_v6 = vadd.s32 %v3186_v12, %v3193_v54  ;;  %v1530_v60 = vsel %vm1526_vm5, %v1510_v31, %v1513_v63  ;;  %v1538_v36 = vsel %vm1526_vm5, %v1516_v15, %v1519_v39 }
 0x129   : > { %v1458_v45 = vclz %v2031_v50  ;;  %v1532_v35 = vsel %vm1528_vm7, %v1516_v15, %v1531_v38  ;;  %v1536_v13 = vsel %vm1528_vm7, %v1519_v39, %v1535_v58  ;;  %v1539_v49 = vsel %vm1529_vm6, %v1525_v26, 1326507024 }
 0x12a   : > { %v1601_v3 = vand.u32 2139095040, %v2350_v19  ;;  %vm1378_vm9 = vweird.f32 %v2344_v9  ;;  %vm3257_vm12 = vcmp.le.f32.partialorder %v1390_v48, 0.7853982  ;;  %v1476_v54 = vsub.s32 4, %v3220_v37 }
 0x12b   : > { %v2032_v12 = vadd.s32 4294967294, %v1458_v45  ;;  %v1537_v42 = vsel %vm1527_vm8, %v1534_v4, %v1536_v13  ;;  %v1540_v27 = vsel %vm1528_vm7, %v1522_v40, %v1539_v49  ;;  %v1533_v48 = vsel %vm1527_vm8, %v1530_v60, %v1532_v35 }
 0x12c   : > { %v1541_v2 = vsel %vm1527_vm8, %v1538_v36, %v1540_v27  ;;  %v3265_v44 = vmul.u32.u64.low %v1542_v33, %v1537_v42  ;;  %v3266_v7 = vmul.u32.u64.high %v1542_v33, %v1537_v42, %v3265_v44  ;;  %v1602_v56 = vshrl.u32 %v1601_v3, 23 }
 0x12d   : > { %vm2033_vm10 = vcmp.lt.s32.totalorder %v2032_v12, 0  ;;  %v3270_v11 = vmul.u32.u64.low %v1542_v33, %v1541_v2  ;;  %v3271_v47 = vmul.u32.u64.high %v1542_v33, %v1541_v2, %v3270_v11  ;;  %vm1381_vm11 = vcmp.lt.s32.totalorder %v3243_v16, 2 }
 0x12e   : > { %vm1392_vm13 = vcmp.lt.s32.totalorder %v2346_v10, 0  ;;  %v1461_v30 = vsel %vm2033_vm10, 0, %v2032_v12  ;;  %v2038_v41 = vadd.s32 4294967169, %v1602_v56  ;;  %vm1382_vm15 = vcmp.eq.s32.totalorder %v3243_v16, 0 }
 0x12f   : > { %v1462_v23 = vsub.s32 32, %v1461_v30  ;;  %v1463_v1 = vshll.u32 %v3233_v24, %v1461_v30  ;;  %v1466_v46 = vsub.s32 4294967266, %v1461_v30  ;;  %vm1385_vm14 = vcmp.eq.s32.totalorder %v3243_v16, 2 }
 0x130   : > { %v2164_v34 = vpop.eup %2163  ;;  %v1549_v43 = vmul.u32 %v1542_v33, %v1533_v48  ;;  %v1552_v8 = vadd.s32 1, %v3266_v7  ;;  %v1608_v22 = vadd.s32 1, %v2038_v41  ;;  %v1477_v31 = vsel %vm1392_vm13, %v1476_v54, %v3220_v37 }
 0x131   : > { %v2166_v0 = vpop.eup %2165  ;;  %v1386_v29 = vxor.u32 2147483648, %v2164_v34  ;;  %v1464_v17 = vshrl.u32 %v1446_v6, %v1462_v23  ;;  %v1467_v25 = vadd.s32 127, %v1466_v46  ;;  %vm1551_vm0 = vc.u32 %v3271_v47, %v3265_v44 }
 0x132   : > { %v1383_v62 = vxor.u32 2147483648, %v2166_v0  ;;  %v1598_v24 = vand.u32 2147483647, %v2350_v19  ;;  %vm1609_vm1 = vcmp.gt.s32.totalorder %v1608_v22, 0  ;;  %v1553_v40 = vsel %vm1551_vm0, %v1552_v8, %v3266_v7 }
 0x133   : > { %v1387_v5 = vsel %vm1385_vm14, %v1386_v29, %v2166_v0  ;;  %v1465_v63 = vor.u32 %v1464_v17, %v1463_v1  ;;  %v1468_v15 = vshll.u32 %v1467_v25, 23  ;;  %v1479_v28 = vsel %vm3257_vm12, 0, %v1477_v31 }
 0x134   : > { %v1384_v51 = vsel %vm1382_vm15, %v2164_v34, %v1383_v62  ;;  %v1554_v37 = vadd.s32 %v1553_v40, %v1549_v43  ;;  %v1610_v39 = vsel %vm1609_vm1, %v1608_v22, 0  ;;  %v1483_v45 = vadd.s32 3, %v1479_v28 }
 0x135   : > { %v1388_v26 = vsel %vm1381_vm11, %v1384_v51, %v1387_v5  ;;  %v1469_v50 = vor.u32 4788187, %v1468_v15  ;;  %v1472_v38 = vcvt.s32.f32 %v1465_v63  ;;  %v1612_v33 = vand.u32 31, %v1610_v39 }
 0x136   : > { %v1389_v4 = vsel %vm1378_vm9, nan, %v1388_v26  ;;  %v1555_v58 = vadd.s32 536870912, %v1554_v37  ;;  %v1605_v60 = vand.u32 8388607, %v1598_v24  ;;  %v1611_v35 = vshrl.u32 %v1610_v39, 5 }
 0x137   : > { %v1470_v6 = vand.u32 2147483647, %v1469_v50  ;;  %1919 = vst [vmem:[%s2636_s25 + $0x48] sm:$0xff] %v1389_v4  ;;  %v1613_v13 = vsub.s32 32, %v1612_v33  ;;  %v1705_v16 = vand.u32 2139095040, %v2352_v20  ;;  %v1615_v3 = vshll.u32 %v2195_v53, %v1612_v33 }
 0x138   : > { %v3297_v36 = vshrl.u32 %v1555_v58, 30  ;;  %v1618_v9 = vshll.u32 %v2196_v55, %v1612_v33  ;;  %v1621_v12 = vshll.u32 %v2197_v57, %v1612_v33  ;;  %v1624_v27 = vshll.u32 %v2198_v59, %v1612_v33 }
 0x139   : > { %v1473_v49 = vmul.f32 %v1472_v38, %v1470_v6  ;;  %v1616_v42 = vshrl.u32 %v2196_v55, %v1613_v13  ;;  %v1627_v2 = vshll.u32 %v2199_v61, %v1612_v33  ;;  %v1619_v56 = vshrl.u32 %v2197_v57, %v1613_v13 }
 0x13a   : > { %v1557_v54 = vshll.u32 %v3297_v36, 30  ;;  %v1622_v48 = vshrl.u32 %v2198_v59, %v1613_v13  ;;  %v1625_v11 = vshrl.u32 %v2199_v61, %v1613_v13  ;;  %v1606_v41 = vor.u32 8388608, %v1605_v60 }
 0x13b   : > { %v1474_v7 = vxor.u32 2147483648, %v1473_v49  ;;  %v1628_v23 = vshrl.u32 %v2200_v14, %v1613_v13  ;;  %vm1630_vm3 = vcmp.lt.s32.totalorder %v1611_v35, 1  ;;  %v1614_v46 = vshrl.u32 %v2195_v53, %v1613_v13 }
 0x13c   : > { %v3310_v30 = vsub.s32 %v1554_v37, %v1557_v54  ;;  %v1617_v34 = vor.u32 %v1616_v42, %v1615_v3  ;;  %v1620_v43 = vor.u32 %v1619_v56, %v1618_v9  ;;  %v1623_v0 = vor.u32 %v1622_v48, %v1621_v12 }
 0x13d   : > { %v1475_v1 = vsel %vm1392_vm13, %v1474_v7, %v1473_v49  ;;  %v1626_v29 = vor.u32 %v1625_v11, %v1624_v27  ;;  %v1629_v17 = vor.u32 %v1628_v23, %v1627_v2  ;;  %vm1633_vm2 = vcmp.lt.s32.totalorder %v1611_v35, 4 }
 0x13e   : > { %v1478_v8 = vsel %vm3257_vm12, %v2346_v10, %v1475_v1  ;;  %v1560_v22 = vsub.s32 0, %v3310_v30  ;;  %v1706_v25 = vshrl.u32 %v1705_v16, 23  ;;  %vm1632_vm4 = vcmp.lt.s32.totalorder %v1611_v35, 3 }
 0x13f   : > { %2167 = vcosq.f32 %v1478_v8  ;;  %v1635_v62 = vsel %vm1633_vm2, %v1623_v0, 2102212464  ;;  %vm1631_vm5 = vcmp.lt.s32.totalorder %v1611_v35, 2  ;;  %v1638_v5 = vsel %vm1630_vm3, %v1617_v34, %v1620_v43 }
 0x140   : > { %2169 = vsinq.f32 %v1478_v8  ;;  %v2035_v31 = vmin.u32 %v1560_v22, %v3310_v30  ;;  %v1639_v32 = vsel %vm1633_vm2, %v1626_v29, 920167782  ;;  %v1646_v63 = vshll.u32 %v1606_v41, 8 }
 0x141   : > { %vm1496_vm6 = vcmp.lt.s32.totalorder %v2348_v18, 0  ;;  %v1634_v40 = vsel %vm1630_vm3, %v1614_v46, %v1617_v34  ;;  %v1636_v51 = vsel %vm1632_vm4, %v1620_v43, %v1635_v62  ;;  %v1642_v28 = vsel %vm1630_vm3, %v1620_v43, %v1623_v0 }
 0x142   : > { %v1562_v15 = vclz %v2035_v31  ;;  %v1484_v37 = vand.u32 3, %v1483_v45  ;;  %v1640_v39 = vsel %vm1632_vm4, %v1623_v0, %v1639_v32  ;;  %v1643_v26 = vsel %vm1633_vm2, %v1629_v17, 1326507024 }
 0x143   : > { %v2042_v50 = vadd.s32 4294967169, %v1706_v25  ;;  %vm1482_vm7 = vweird.f32 %v2346_v10  ;;  %v1550_v38 = vadd.s32 %v3265_v44, %v3271_v47  ;;  %v1641_v58 = vsel %vm1631_vm5, %v1638_v5, %v1640_v39 }
 0x144   : > { %v2036_v4 = vadd.s32 4294967294, %v1562_v15  ;;  %v1644_v33 = vsel %vm1632_vm4, %v1626_v29, %v1643_v26  ;;  %v1637_v6 = vsel %vm1631_vm5, %v1634_v40, %v1636_v51  ;;  %vm1485_vm9 = vcmp.lt.s32.totalorder %v1484_v37, 2 }
 0x145   : > { %v1645_v60 = vsel %vm1631_vm5, %v1642_v28, %v1644_v33  ;;  %v3337_v45 = vmul.u32.u64.low %v1646_v63, %v1641_v58  ;;  %v3338_v13 = vmul.u32.u64.high %v1646_v63, %v1641_v58, %v3337_v45  ;;  %v1712_v3 = vadd.s32 1, %v2042_v50 }
 0x146   : > { %vm2037_vm8 = vcmp.lt.s32.totalorder %v2036_v4, 0  ;;  %v3341_v16 = vmul.u32.u64.low %v1646_v63, %v1645_v60  ;;  %v3342_v49 = vmul.u32.u64.high %v1646_v63, %v1645_v60, %v3341_v16  ;;  %vm1489_vm12 = vcmp.eq.s32.totalorder %v1484_v37, 2 }
 0x147   : > { %v1565_v44 = vsel %vm2037_vm8, 0, %v2036_v4  ;;  %v1580_v47 = vsub.s32 4, %v3297_v36  ;;  %vm1713_vm10 = vcmp.gt.s32.totalorder %v1712_v3, 0  ;;  %vm3348_vm11 = vcmp.le.f32.partialorder %v1494_v52, 0.7853982 }
 0x148   : > { %v1566_v9 = vsub.s32 32, %v1565_v44  ;;  %v1567_v12 = vshll.u32 %v3310_v30, %v1565_v44  ;;  %v1570_v54 = vsub.s32 4294967266, %v1565_v44  ;;  %v1653_v27 = vmul.u32 %v1646_v63, %v1637_v6 }
 0x149   : > { %v2168_v35 = vpop.eup %2167  ;;  %v1656_v2 = vadd.s32 1, %v3338_v13  ;;  %v1702_v7 = vand.u32 2147483647, %v2352_v20  ;;  %v1714_v56 = vsel %vm1713_vm10, %v1712_v3, 0  ;;  %vm1486_vm13 = vcmp.eq.s32.totalorder %v1484_v37, 0 }
 0x14a   : > { %v2170_v48 = vpop.eup %2169  ;;  %v1490_v11 = vxor.u32 2147483648, %v2168_v35  ;;  %v1568_v41 = vshrl.u32 %v1550_v38, %v1566_v9  ;;  %v1571_v30 = vadd.s32 127, %v1570_v54  ;;  %v1581_v1 = vsel %vm1496_vm6, %v1580_v47, %v3297_v36 }
 0x14b   : > { %v1487_v23 = vxor.u32 2147483648, %v2170_v48  ;;  %vm1655_vm15 = vc.u32 %v3342_v49, %v3337_v45  ;;  %v1716_v52 = vand.u32 31, %v1714_v56  ;;  %v1709_v29 = vand.u32 8388607, %v1702_v7 }
 0x14c   : > { %v1491_v46 = vsel %vm1489_vm12, %v1490_v11, %v2170_v48  ;;  %v1569_v34 = vor.u32 %v1568_v41, %v1567_v12  ;;  %v1572_v43 = vshll.u32 %v1571_v30, 23  ;;  %v1657_v8 = vsel %vm1655_vm15, %v1656_v2, %v3338_v13 }
 0x14d   : > { %v1488_v22 = vsel %vm1486_vm13, %v2168_v35, %v1487_v23  ;;  %v1658_v0 = vadd.s32 %v1657_v8, %v1653_v27  ;;  %v1717_v17 = vsub.s32 32, %v1716_v52  ;;  %v1715_v62 = vshrl.u32 %v1714_v56, 5 }
 0x14e   : > { %v1492_v25 = vsel %vm1485_vm9, %v1488_v22, %v1491_v46  ;;  %v1573_v36 = vor.u32 4788187, %v1572_v43  ;;  %v1576_v31 = vcvt.s32.f32 %v1569_v34  ;;  %v1719_v63 = vshll.u32 %v2195_v53, %v1716_v52 }
 0x14f   : > { %v1493_v5 = vsel %vm1482_vm7, nan, %v1492_v25  ;;  %v1659_v32 = vadd.s32 536870912, %v1658_v0  ;;  %v1722_v15 = vshll.u32 %v2196_v55, %v1716_v52  ;;  %v1720_v51 = vshrl.u32 %v2196_v55, %v1717_v17 }
 0x150   : > { %v1574_v40 = vand.u32 2147483647, %v1573_v36  ;;  %v1723_v28 = vshrl.u32 %v2197_v57, %v1717_v17  ;;  %v1725_v39 = vshll.u32 %v2197_v57, %v1716_v52  ;;  %1920 = vst [vmem:[%s2636_s25 + $0x50] sm:$0xff] %v1493_v5  ;;  %v1726_v26 = vshrl.u32 %v2198_v59, %v1717_v17 }
 0x151   : > { %v3372_v37 = vshrl.u32 %v1659_v32, 30  ;;  %v1728_v10 = vshll.u32 %v2198_v59, %v1716_v52  ;;  %v1729_v50 = vshrl.u32 %v2199_v61, %v1717_v17  ;;  %v1583_v4 = vsel %vm3348_vm11, 0, %v1581_v1 }
 0x152   : > { %v1577_v38 = vmul.f32 %v1576_v31, %v1574_v40  ;;  %v1731_v58 = vshll.u32 %v2199_v61, %v1716_v52  ;;  %v1710_v6 = vor.u32 8388608, %v1709_v29  ;;  %v1718_v60 = vshrl.u32 %v2195_v53, %v1717_v17 }
 0x153   : > { %v1661_v33 = vshll.u32 %v3372_v37, 30  ;;  %v1732_v13 = vshrl.u32 %v2200_v14, %v1717_v17  ;;  %v1721_v3 = vor.u32 %v1720_v51, %v1719_v63  ;;  %v1724_v44 = vor.u32 %v1723_v28, %v1722_v15 }
 0x154   : > { %v1578_v16 = vxor.u32 2147483648, %v1577_v38  ;;  %v1730_v47 = vor.u32 %v1729_v50, %v1728_v10  ;;  %v1727_v12 = vor.u32 %v1726_v26, %v1725_v39  ;;  %vm1734_vm14 = vcmp.lt.s32.totalorder %v1715_v62, 1 }
 0x155   : > { %v1662_v9 = vsub.s32 %v1658_v0, %v1661_v33  ;;  %vm1737_vm0 = vcmp.lt.s32.totalorder %v1715_v62, 4  ;;  %v1587_v35 = vadd.s32 3, %v1583_v4  ;;  %v1733_v27 = vor.u32 %v1732_v13, %v1731_v58 }
 0x156   : > { %v1579_v54 = vsel %vm1496_vm6, %v1578_v16, %v1577_v38  ;;  %vm1736_vm1 = vcmp.lt.s32.totalorder %v1715_v62, 3  ;;  %vm1735_vm3 = vcmp.lt.s32.totalorder %v1715_v62, 2  ;;  %v1739_v48 = vsel %vm1737_vm0, %v1727_v12, 2102212464 }
 0x157   : > { %v1582_v2 = vsel %vm3348_vm11, %v2348_v18, %v1579_v54  ;;  %v1664_v56 = vsub.s32 0, %v1662_v9  ;;  %v1742_v11 = vsel %vm1734_vm14, %v1721_v3, %v1724_v44  ;;  %v1743_v41 = vsel %vm1737_vm0, %v1730_v47, 920167782 }
 0x158   : > { %2171 = vcosq.f32 %v1582_v2  ;;  %v1750_v30 = vshll.u32 %v1710_v6, 8  ;;  %v1738_v1 = vsel %vm1734_vm14, %v1718_v60, %v1721_v3  ;;  %v1744_v52 = vsel %vm1736_vm1, %v1727_v12, %v1743_v41 }
 0x159   : > { %2173 = vsinq.f32 %v1582_v2  ;;  %v2039_v23 = vmin.u32 %v1664_v56, %v1662_v9  ;;  %v1740_v46 = vsel %vm1736_vm1, %v1724_v44, %v1739_v48  ;;  %v1745_v42 = vsel %vm1735_vm3, %v1742_v11, %v1744_v52 }
 0x15a   : > { %v1746_v34 = vsel %vm1734_vm14, %v1724_v44, %v1727_v12  ;;  %v1747_v43 = vsel %vm1737_vm0, %v1733_v27, 1326507024  ;;  %v3398_v0 = vmul.u32.u64.low %v1750_v30, %v1745_v42  ;;  %v3399_v29 = vmul.u32.u64.high %v1750_v30, %v1745_v42, %v3398_v0 }
 0x15b   : > { %v1666_v8 = vclz %v2039_v23  ;;  %v1748_v22 = vsel %vm1736_vm1, %v1730_v47, %v1747_v43  ;;  %v1741_v25 = vsel %vm1735_vm3, %v1738_v1, %v1740_v46  ;;  %v1809_v31 = vand.u32 2139095040, %v2354_v21 }
 0x15c   : > { %v1749_v36 = vsel %vm1735_vm3, %v1746_v34, %v1748_v22  ;;  %v1588_v5 = vand.u32 3, %v1587_v35  ;;  %v1654_v15 = vadd.s32 %v3337_v45, %v3342_v49  ;;  %v1757_v28 = vmul.u32 %v1750_v30, %v1741_v25 }
 0x15d   : > { %v2040_v17 = vadd.s32 4294967294, %v1666_v8  ;;  %v3405_v32 = vmul.u32.u64.low %v1750_v30, %v1749_v36  ;;  %v3406_v63 = vmul.u32.u64.high %v1750_v30, %v1749_v36, %v3405_v32  ;;  %v1810_v40 = vshrl.u32 %v1809_v31, 23 }
 0x15e   : > { %v1760_v39 = vadd.s32 1, %v3399_v29  ;;  %vm1586_vm4 = vweird.f32 %v2348_v18  ;;  %vm1590_vm5 = vcmp.eq.s32.totalorder %v1588_v5, 0  ;;  %vm1593_vm6 = vcmp.eq.s32.totalorder %v1588_v5, 2 }
 0x15f   : > { %vm2041_vm2 = vcmp.lt.s32.totalorder %v2040_v17, 0  ;;  %v2046_v62 = vadd.s32 4294967169, %v1810_v40  ;;  %vm1759_vm7 = vc.u32 %v3406_v63, %v3398_v0  ;;  %vm1589_vm8 = vcmp.lt.s32.totalorder %v1588_v5, 2 }
 0x160   : > { %v1669_v51 = vsel %vm2041_vm2, 0, %v2040_v17  ;;  %v1761_v33 = vsel %vm1759_vm7, %v1760_v39, %v3399_v29  ;;  %v1806_v47 = vand.u32 2147483647, %v2354_v21  ;;  %v1684_v12 = vsub.s32 4, %v3372_v37 }
 0x161   : > { %v1670_v26 = vsub.s32 32, %v1669_v51  ;;  %v1671_v10 = vshll.u32 %v1662_v9, %v1669_v51  ;;  %v1674_v50 = vsub.s32 4294967266, %v1669_v51  ;;  %v1762_v60 = vadd.s32 %v1761_v33, %v1757_v28 }
 0x162   : > { %v2172_v38 = vpop.eup %2171  ;;  %v1816_v13 = vadd.s32 1, %v2046_v62  ;;  %vm1600_vm12 = vcmp.lt.s32.totalorder %v2350_v19, 0  ;;  %vm3426_vm10 = vcmp.le.f32.partialorder %v1598_v24, 0.7853982  ;;  %v1813_v52 = vand.u32 8388607, %v1806_v47 }
 0x163   : > { %v2174_v4 = vpop.eup %2173  ;;  %v1594_v45 = vxor.u32 2147483648, %v2172_v38  ;;  %v1672_v49 = vshrl.u32 %v1654_v15, %v1670_v26  ;;  %v1675_v58 = vadd.s32 127, %v1674_v50  ;;  %v1763_v54 = vadd.s32 536870912, %v1762_v60 }
 0x164   : > { %v1591_v6 = vxor.u32 2147483648, %v2174_v4  ;;  %vm1817_vm9 = vcmp.gt.s32.totalorder %v1816_v13, 0  ;;  %v1685_v42 = vsel %vm1600_vm12, %v1684_v12, %v3372_v37  ;;  %v1814_v32 = vor.u32 8388608, %v1813_v52 }
 0x165   : > { %v1595_v16 = vsel %vm1593_vm6, %v1594_v45, %v2174_v4  ;;  %v1673_v3 = vor.u32 %v1672_v49, %v1671_v10  ;;  %v1676_v44 = vshll.u32 %v1675_v58, 23  ;;  %v1818_v56 = vsel %vm1817_vm9, %v1816_v13, 0 }
 0x166   : > { %v1592_v9 = vsel %vm1590_vm5, %v2172_v38, %v1591_v6  ;;  %v3420_v11 = vshrl.u32 %v1763_v54, 30  ;;  %v1820_v41 = vand.u32 31, %v1818_v56  ;;  %v1819_v34 = vshrl.u32 %v1818_v56, 5 }
 0x167   : > { %v1596_v35 = vsel %vm1589_vm8, %v1592_v9, %v1595_v16  ;;  %v1677_v27 = vor.u32 4788187, %v1676_v44  ;;  %v1680_v2 = vcvt.s32.f32 %v1673_v3  ;;  %v1687_v37 = vsel %vm3426_vm10, 0, %v1685_v42 }
 0x168   : > { %v1597_v48 = vsel %vm1586_vm4, nan, %v1596_v35  ;;  %v1765_v1 = vshll.u32 %v3420_v11, 30  ;;  %v1821_v18 = vsub.s32 32, %v1820_v41  ;;  %v1823_v43 = vshll.u32 %v2195_v53, %v1820_v41 }
 0x169   : > { %v1678_v30 = vand.u32 2147483647, %v1677_v27  ;;  %1921 = vst [vmem:[%s2636_s25 + $0x58] sm:$0xff] %v1597_v48  ;;  %v1826_v22 = vshll.u32 %v2196_v55, %v1820_v41  ;;  %v1829_v29 = vshll.u32 %v2197_v57, %v1820_v41  ;;  %v1832_v31 = vshll.u32 %v2198_v59, %v1820_v41 }
 0x16a   : > { %v3437_v8 = vsub.s32 %v1762_v60, %v1765_v1  ;;  %v1824_v24 = vshrl.u32 %v2196_v55, %v1821_v18  ;;  %v1827_v25 = vshrl.u32 %v2197_v57, %v1821_v18  ;;  %v1830_v36 = vshrl.u32 %v2198_v59, %v1821_v18 }
 0x16b   : > { %v1681_v46 = vmul.f32 %v1680_v2, %v1678_v30  ;;  %v1833_v15 = vshrl.u32 %v2199_v61, %v1821_v18  ;;  %v1822_v40 = vshrl.u32 %v2195_v53, %v1821_v18  ;;  %v1835_v57 = vshll.u32 %v2199_v61, %v1820_v41 }
 0x16c   : > { %v1768_v5 = vsub.s32 0, %v3437_v8  ;;  %v1825_v51 = vor.u32 %v1824_v24, %v1823_v43  ;;  %v1828_v39 = vor.u32 %v1827_v25, %v1826_v22  ;;  %v1831_v26 = vor.u32 %v1830_v36, %v1829_v29 }
 0x16d   : > { %v1682_v17 = vxor.u32 2147483648, %v1681_v46  ;;  %v1834_v10 = vor.u32 %v1833_v15, %v1832_v31  ;;  %v1836_v50 = vshrl.u32 %v2200_v14, %v1821_v18  ;;  %vm1838_vm11 = vcmp.lt.s32.totalorder %v1819_v34, 1 }
 0x16e   : > { %v2043_v28 = vmin.u32 %v1768_v5, %v3437_v8  ;;  %v1691_v62 = vadd.s32 3, %v1687_v37  ;;  %v1854_v53 = vshll.u32 %v1814_v32, 8  ;;  %vm1839_vm13 = vcmp.lt.s32.totalorder %v1819_v34, 2 }
 0x16f   : > { %v1683_v55 = vsel %vm1600_vm12, %v1682_v17, %v1681_v46  ;;  %v1837_v4 = vor.u32 %v1836_v50, %v1835_v57  ;;  %vm1840_vm15 = vcmp.lt.s32.totalorder %v1819_v34, 3  ;;  %vm1841_vm14 = vcmp.lt.s32.totalorder %v1819_v34, 4 }
 0x170   : > { %v1686_v59 = vsel %vm3426_vm10, %v2350_v19, %v1683_v55  ;;  %v1770_v38 = vclz %v2043_v28  ;;  %v1842_v45 = vsel %vm1838_vm11, %v1822_v40, %v1825_v51  ;;  %v1843_v49 = vsel %vm1841_vm14, %v1831_v26, 2102212464 }
 0x171   : > { %2175 = vcosq.f32 %v1686_v59  ;;  %v1846_v58 = vsel %vm1838_vm11, %v1825_v51, %v1828_v39  ;;  %v1844_v33 = vsel %vm1840_vm15, %v1828_v39, %v1843_v49  ;;  %v1847_v6 = vsel %vm1841_vm14, %v1834_v10, 920167782 }
 0x172   : > { %2177 = vsinq.f32 %v1686_v59  ;;  %v2044_v61 = vadd.s32 4294967294, %v1770_v38  ;;  %v1850_v60 = vsel %vm1838_vm11, %v1828_v39, %v1831_v26  ;;  %v1851_v13 = vsel %vm1841_vm14, %v1837_v4, 1326507024 }
 0x173   : > { %v1758_v14 = vadd.s32 %v3398_v0, %v3406_v63  ;;  %v1848_v16 = vsel %vm1840_vm15, %v1831_v26, %v1847_v6  ;;  %v1852_v3 = vsel %vm1840_vm15, %v1834_v10, %v1851_v13  ;;  %v1692_v44 = vand.u32 3, %v1691_v62 }
 0x174   : > { %vm2045_vm0 = vcmp.lt.s32.totalorder %v2044_v61, 0  ;;  %v1849_v12 = vsel %vm1839_vm13, %v1846_v58, %v1848_v16  ;;  %v1853_v54 = vsel %vm1839_vm13, %v1850_v60, %v1852_v3  ;;  %v1845_v56 = vsel %vm1839_vm13, %v1842_v45, %v1844_v33 }
 0x175   : > { %v1773_v9 = vsel %vm2045_vm0, 0, %v2044_v61  ;;  %v3464_v48 = vmul.u32.u64.low %v1854_v53, %v1853_v54  ;;  %v3465_v41 = vmul.u32.u64.high %v1854_v53, %v1853_v54, %v3464_v48  ;;  %vm1694_vm1 = vcmp.eq.s32.totalorder %v1692_v44, 0 }
 0x176   : > { %v1774_v35 = vsub.s32 32, %v1773_v9  ;;  %v1775_v27 = vshll.u32 %v3437_v8, %v1773_v9  ;;  %v1778_v2 = vsub.s32 4294967266, %v1773_v9  ;;  %vm1697_vm3 = vcmp.eq.s32.totalorder %v1692_v44, 2 }
 0x177   : > { %v3467_v30 = vmul.u32.u64.low %v1854_v53, %v1849_v12  ;;  %v3468_v0 = vmul.u32.u64.high %v1854_v53, %v1849_v12, %v3467_v30  ;;  %v1861_v43 = vmul.u32 %v1854_v53, %v1845_v56  ;;  %vm1693_vm2 = vcmp.lt.s32.totalorder %v1692_v44, 2 }
 0x178   : > { %v1776_v63 = vshrl.u32 %v1758_v14, %v1774_v35  ;;  %v1779_v23 = vadd.s32 127, %v1778_v2  ;;  %vm1690_vm5 = vweird.f32 %v2350_v19  ;;  %v1788_v37 = vsub.s32 4, %v3420_v11 }
 0x179   : > { %vm1863_vm4 = vc.u32 %v3465_v41, %v3467_v30  ;;  %v1864_v34 = vadd.s32 1, %v3468_v0  ;;  %vm1704_vm6 = vcmp.lt.s32.totalorder %v2352_v20, 0  ;;  %vm1703_vm7 = vcmp.le.f32.partialorder %v1702_v7, 0.7853982 }
 0x17a   : > { %v1777_v46 = vor.u32 %v1776_v63, %v1775_v27  ;;  %v1780_v42 = vshll.u32 %v1779_v23, 23  ;;  %v1789_v40 = vsel %vm1704_vm6, %v1788_v37, %v3420_v11  ;;  %v1862_v7 = vadd.s32 %v3467_v30, %v3465_v41 }
 0x17b   : > { %v2176_v1 = vpop.eup %2175  ;;  %v1865_v25 = vsel %vm1863_vm4, %v1864_v34, %v3468_v0  ;;  %v1791_v39 = vsel %vm1703_vm7, 0, %v1789_v40  ;;  %vm1794_vm11 = vweird.f32 %v2352_v20  ;;  %vm1808_vm13 = vcmp.lt.s32.totalorder %v2354_v21, 0 }
 0x17c   : > { %v2178_v52 = vpop.eup %2177  ;;  %v1698_v18 = vxor.u32 2147483648, %v2176_v1  ;;  %v1781_v22 = vor.u32 4788187, %v1780_v42  ;;  %v1784_v29 = vcvt.s32.f32 %v1777_v46  ;;  %v1866_v5 = vadd.s32 %v1865_v25, %v1861_v43 }
 0x17d   : > { %v1695_v8 = vxor.u32 2147483648, %v2178_v52  ;;  %v1795_v10 = vadd.s32 3, %v1791_v39  ;;  %vm1807_vm15 = vcmp.le.f32.partialorder %v1806_v47, 0.7853982 }
 0x17e   : > { %v1699_v24 = vsel %vm1697_vm3, %v1698_v18, %v2178_v52  ;;  %v1782_v31 = vand.u32 2147483647, %v1781_v22  ;;  %v1867_v55 = vadd.s32 536870912, %v1866_v5  ;;  %vm1898_vm3 = vweird.f32 %v2354_v21 }
 0x17f   : > { %v1696_v17 = vsel %vm1694_vm1, %v2176_v1, %v1695_v8  ;;  %v1796_v38 = vand.u32 3, %v1795_v10 }
 0x180   : > { %v1700_v36 = vsel %vm1693_vm2, %v1696_v17, %v1699_v24  ;;  %v1785_v15 = vmul.f32 %v1784_v29, %v1782_v31  ;;  %v1868_v51 = vshrl.u32 %v1867_v55, 30 }
 0x181   : > { %v1701_v32 = vsel %vm1690_vm5, nan, %v1700_v36  ;;  %vm1801_vm8 = vcmp.eq.s32.totalorder %v1796_v38, 2  ;;  %vm1797_vm12 = vcmp.lt.s32.totalorder %v1796_v38, 2  ;;  %vm1798_vm10 = vcmp.eq.s32.totalorder %v1796_v38, 0 }
 0x182   : > { %1922 = vst [vmem:[%s2636_s25 + $0x60] sm:$0xff] %v1701_v32  ;;  %v1786_v19 = vxor.u32 2147483648, %v1785_v15  ;;  %v1869_v59 = vshll.u32 %v1868_v51, 30  ;;  %v1892_v56 = vsub.s32 4, %v1868_v51 }
 0x184   : > { %v1787_v57 = vsel %vm1704_vm6, %v1786_v19, %v1785_v15  ;;  %v1870_v26 = vsub.s32 %v1866_v5, %v1869_v59  ;;  %v1893_v41 = vsel %vm1808_vm13, %v1892_v56, %v1868_v51 }
 0x185   : > { %v1790_v28 = vsel %vm1703_vm7, %v2352_v20, %v1787_v57  ;;  %v1895_v63 = vsel %vm1807_vm15, 0, %v1893_v41 }
 0x186   : > { %2179 = vcosq.f32 %v1790_v28  ;;  %v1872_v50 = vsub.s32 0, %v1870_v26  ;;  %v1899_v23 = vadd.s32 3, %v1895_v63 }
 0x187   : > { %2181 = vsinq.f32 %v1790_v28 }
 0x188   : > { %v2047_v62 = vmin.u32 %v1872_v50, %v1870_v26  ;;  %v1900_v1 = vand.u32 3, %v1899_v23 }
 0x18a   : > { %v1874_v53 = vclz %v2047_v62  ;;  %vm1905_vm14 = vcmp.eq.s32.totalorder %v1900_v1, 2  ;;  %vm1902_vm0 = vcmp.eq.s32.totalorder %v1900_v1, 0  ;;  %vm1901_vm1 = vcmp.lt.s32.totalorder %v1900_v1, 2 }
 0x18c   : > { %v2048_v4 = vadd.s32 4294967294, %v1874_v53 }
 0x18e   : > { %vm2049_vm9 = vcmp.lt.s32.totalorder %v2048_v4, 0 }
 0x18f   : > { %v1877_v49 = vsel %vm2049_vm9, 0, %v2048_v4 }
 0x190   : > { %v2180_v61 = vpop.eup %2179  ;;  %v1878_v33 = vsub.s32 32, %v1877_v49  ;;  %v1879_v6 = vshll.u32 %v1870_v26, %v1877_v49  ;;  %v1882_v60 = vsub.s32 4294967266, %v1877_v49 }
 0x191   : > { %v2182_v11 = vpop.eup %2181  ;;  %v1802_v45 = vxor.u32 2147483648, %v2180_v61 }
 0x192   : > { %v1799_v58 = vxor.u32 2147483648, %v2182_v11  ;;  %v1880_v16 = vshrl.u32 %v1862_v7, %v1878_v33  ;;  %v1883_v3 = vadd.s32 127, %v1882_v60 }
 0x193   : > { %v1803_v13 = vsel %vm1801_vm8, %v1802_v45, %v2182_v11 }
 0x194   : > { %v1800_v14 = vsel %vm1798_vm10, %v2180_v61, %v1799_v58  ;;  %v1881_v12 = vor.u32 %v1880_v16, %v1879_v6  ;;  %v1884_v54 = vshll.u32 %v1883_v3, 23 }
 0x195   : > { %v1804_v44 = vsel %vm1797_vm12, %v1800_v14, %v1803_v13 }
 0x196   : > { %v1805_v9 = vsel %vm1794_vm11, nan, %v1804_v44  ;;  %v1885_v35 = vor.u32 4788187, %v1884_v54  ;;  %v1888_v27 = vcvt.s32.f32 %v1881_v12 }
 0x197   : > { %1923 = vst [vmem:[%s2636_s25 + $0x68] sm:$0xff] %v1805_v9 }
 0x198   : > { %v1886_v2 = vand.u32 2147483647, %v1885_v35 }
 0x19a   : > { %v1889_v48 = vmul.f32 %v1888_v27, %v1886_v2 }
 0x19c   : > { %v1890_v20 = vxor.u32 2147483648, %v1889_v48 }
 0x19e   : > { %v1891_v30 = vsel %vm1808_vm13, %v1890_v20, %v1889_v48 }
 0x19f   : > { %v1894_v0 = vsel %vm1807_vm15, %v2354_v21, %v1891_v30 }
 0x1a0   : > { %2183 = vcosq.f32 %v1894_v0 }
 0x1a1   : > { %2185 = vsinq.f32 %v1894_v0 }
 0x1aa   : > { %v2184_v52 = vpop.eup %2183 }
 0x1ab   : > { %v2186_v18 = vpop.eup %2185  ;;  %v1906_v46 = vxor.u32 2147483648, %v2184_v52 }
 0x1ac   : > { %v1903_v42 = vxor.u32 2147483648, %v2186_v18 }
 0x1ad   : > { %v1907_v47 = vsel %vm1905_vm14, %v1906_v46, %v2186_v18 }
 0x1ae   : > { %v1904_v43 = vsel %vm1902_vm0, %v2184_v52, %v1903_v42 }
 0x1af   : > { %v1908_v8 = vsel %vm1901_vm1, %v1904_v43, %v1907_v47 }
 0x1b0   : > { %v1909_v34 = vsel %vm1898_vm3, nan, %v1908_v8 }
 0x1b1   : > { %1924 = vst [vmem:[%s2636_s25 + $0x70] sm:$0xff] %v1909_v34 }
 0x1b2 PF: > { %s12_s9 = sadd.s32 1, %s2193_s9  }
 0x1b3   : > { %p9_p4 = scmp.ge.s32.totalorder %s12_s9, 4  }
 0x1b5   :  { %11 = sbr.rel (!%p9_p4) target bundleno = 1 (0x1), region = 61 }

</bundles_post_ra>
